<compile_context>
chip_gen: v7x
topology: tpu7x:2x2x1
jax: 0.10.0
libtpu: 0.0.40
codegen_flags: <defaults>
</compile_context>

<pallas_src>
import numpy as np
import jax
import jax.numpy as jnp
from jax.experimental import pallas as pl
from jax.experimental.pallas import tpu as pltpu

# ----------------------------- configuration ------------------------------
B = 16             # batch
IN_SHAPE = 32      # input_shape
EM_IN = 16         # em_input_shape
HID = 64           # hidden_shapes = [64, 64]; em_hidden_shapes = [64]
MODULE_HIDDEN = 64
GATING_HIDDEN = 64
NUM_GATING_LAYERS = 2
L = 4              # num_layers
M = 4              # num_modules
OUT_SHAPE = 10     # output_shape
MM = M * M                      # 16
COND_MAX = (L - 1) * MM         # 48
SLAB = M * MODULE_HIDDEN        # 256  (fused module slab width)
REP = M * SLAB                  # 1024 (rolled-multiplier slab width)
COND_WIDE = (L - 1) * GATING_HIDDEN  # 192 (stacked cond-fc output width)
OUT_PAD = 128                   # lane-dense padded output width


# ------------------------- parameter initialization ------------------------
def fanin_linear(key, in_dim, out_dim):
    # mirrors _fanin_init quirk: fan_in = weight.size(0) = out_features
    bound = float(np.sqrt(1.0 / out_dim))
    w_pt = jax.random.uniform(key, (out_dim, in_dim), jnp.float32, -bound, bound)
    b = jnp.full((out_dim,), 0.1, jnp.float32)          # _constant_bias_init
    return w_pt.T, b                                     # [in, out], [out]


def uniform_linear(key, in_dim, out_dim, p=0.003):
    kw, kb = jax.random.split(key)
    w_pt = jax.random.uniform(kw, (out_dim, in_dim), jnp.float32, -p, p)
    b = jax.random.uniform(kb, (out_dim,), jnp.float32, -p, p)
    return w_pt.T, b


def init_params(key):
    keys = jax.random.split(key, 64)
    ki = iter(keys)
    p = {}

    # base MLP: IN_SHAPE -> 64 -> 64 (basic_init)
    w, b = fanin_linear(next(ki), IN_SHAPE, HID); p['bW0'], p['bb0'] = w, b[None, :]
    w, b = fanin_linear(next(ki), HID, HID);      p['bW1'], p['bb1'] = w, b[None, :]
    # em base: EM_IN -> 64 (basic_init)
    w, b = fanin_linear(next(ki), EM_IN, HID);    p['eW'], p['eb'] = w, b[None, :]

    # gating fcs (basic_init), all GATING_HIDDEN -> GATING_HIDDEN
    gfW, gfb = [], []
    for _ in range(NUM_GATING_LAYERS):
        w, b = fanin_linear(next(ki), GATING_HIDDEN, GATING_HIDDEN)
        gfW.append(w); gfb.append(b)
    p['gfW'] = jnp.stack(gfW)                    # (NG, 64, 64)
    p['gfb'] = jnp.stack(gfb)[:, None, :]        # (NG, 1, 64)

    # gating_weight_fc_0 .. fc_{L-2} (uniform_init), GATING_HIDDEN -> M*M
    gwW, gwb = [], []
    for _ in range(L - 1):
        w, b = uniform_linear(next(ki), GATING_HIDDEN, MM)
        gwW.append(w); gwb.append(b)
    p['gwW'] = jnp.stack(gwW)                    # (L-1, 64, 16)
    p['gwb'] = jnp.stack(gwb)[:, None, :]        # (L-1, 1, 16)

    # cond fcs (basic_init): cond_fc_k has input (k)*M*M, zero-padded to COND_MAX
    cW, cb = [], []
    for idx in range(L - 2):
        w, b = fanin_linear(next(ki), (idx + 1) * MM, GATING_HIDDEN)
        w = jnp.pad(w, ((0, COND_MAX - w.shape[0]), (0, 0)))
        cW.append(w); cb.append(b)
    w, b = fanin_linear(next(ki), COND_MAX, GATING_HIDDEN)   # cond_last
    cW.append(w); cb.append(b)
    p['cW'] = jnp.stack(cW)                      # (L-1, 48, 64)
    p['cb'] = jnp.stack(cb)[:, None, :]          # (L-1, 1, 64)

    # gating_weight_last (uniform_init): GATING_HIDDEN -> M
    w, b = uniform_linear(next(ki), GATING_HIDDEN, M)
    p['glW'], p['glb'] = w, b[None, :]

    # layer modules (basic_init, add_bn=False): all 64 -> 64
    mWs, mbs = [], []
    for i in range(L):
        rW, rb = [], []
        in_dim = HID if i == 0 else MODULE_HIDDEN
        for _ in range(M):
            w, b = fanin_linear(next(ki), in_dim, MODULE_HIDDEN)
            rW.append(w); rb.append(b)
        mWs.append(jnp.stack(rW)); mbs.append(jnp.stack(rb))
    p['mW'] = jnp.stack(mWs)                     # (L, M, 64, 64)
    p['mb'] = jnp.stack(mbs)[:, :, None, :]      # (L, M, 1, 64)

    # last (uniform_init): MODULE_HIDDEN -> OUT_SHAPE
    w, b = uniform_linear(next(ki), MODULE_HIDDEN, OUT_SHAPE)
    p['lW'], p['lb'] = w, b[None, :]
    return p


# --------------------- host-side fusing / packing of params ----------------
def pack_params(p):
    bf = lambda a: jnp.asarray(a, jnp.bfloat16)   # matmul operands -> bf16
    f = lambda a: jnp.asarray(a, jnp.float32)     # biases stay f32

    # gating_weight_fc_0..2 and gating_weight_last stacked; the last one is
    # zero-padded to 16 outputs with a -1e9 bias so a full 16-lane softmax
    # reproduces the 4-way softmax exactly (padded lanes underflow to 0).
    glW_pad = jnp.pad(p['glW'], ((0, 0), (0, MM - M)))                    # (64,16)
    glb_pad = jnp.concatenate(
        [p['glb'], jnp.full((1, MM - M), -1e9, jnp.float32)], axis=1)     # (1,16)
    gwW = jnp.concatenate([p['gwW'], glW_pad[None]], axis=0)              # (4,64,16)
    gwb = jnp.concatenate([p['gwb'], glb_pad[None]], axis=0)              # (4,1,16)

    # Cond fcs merged per SOURCE softmax-weight sm_t: cC[t] stacks, along the
    # output dim, the (16,64) blocks of every cond fc c >= t that consumes
    # sm_t.  Block for target c sits at lanes [64*(c-t), 64*(c-t)+64).
    blocks = p['cW'].reshape(L - 1, L - 1, MM, GATING_HIDDEN)             # [c,t,16,64]
    cC = []
    for t in range(L - 1):
        w = jnp.concatenate([blocks[c, t] for c in range(t, L - 1)], axis=1)
        w = jnp.pad(w, ((0, 0), (0, COND_WIDE - w.shape[1])))
        cC.append(w)
    cC = jnp.stack(cC)                                                    # (3,16,192)

    # all (1,64) biases stacked: bb0, bb1, eb, gfb0, gfb1, cb0, cb1, cb2
    b64 = jnp.concatenate(
        [p['bb0'], p['bb1'], p['eb'], p['gfb'][0], p['gfb'][1], p['cb'][:, 0, :]],
        axis=0)[:, None, :]                                               # (8,1,64)

    # layer-0 modules fused along the output dim
    W0c = jnp.concatenate([p['mW'][0, j] for j in range(M)], axis=1)      # (64,256)
    b0c = jnp.concatenate([p['mb'][0, j] for j in range(M)], axis=1)      # (1,256)

    # layers 1..L-1 modules fused as block-diagonal (256,256) weights
    def block_diag(ws):
        z = jnp.zeros((SLAB, SLAB), jnp.float32)
        for j in range(M):
            z = z.at[j * MODULE_HIDDEN:(j + 1) * MODULE_HIDDEN,
                     j * MODULE_HIDDEN:(j + 1) * MODULE_HIDDEN].set(ws[j])
        return z
    Wbd = jnp.stack([block_diag(p['mW'][i + 1]) for i in range(L - 1)])   # (3,256,256)
    bbd = jnp.stack([jnp.concatenate([p['mb'][i + 1, j] for j in range(M)], axis=1)
                     for i in range(L - 1)])                              # (3,1,256)

    # final Linear, lane-dense padded; rows 64..127 are zero because the
    # accumulator arrives duplicated across the two 64-lane halves.
    lW2 = jnp.zeros((2 * MODULE_HIDDEN, OUT_PAD), jnp.float32)
    lW2 = lW2.at[:MODULE_HIDDEN, :OUT_SHAPE].set(p['lW'])
    lb2 = jnp.zeros((1, OUT_PAD), jnp.float32).at[:, :OUT_SHAPE].set(p['lb'])

    # structural 0/1 matrices (exact in bf16):
    #   R2 : roll-compatible gating-weight replication.  Chunk r (lanes
    #        r*256..r*256+255) carries, at lanes j*64+d, the flat weight
    #        p = j*4 + (j-r)%4, i.e. the multiplier for the source module that
    #        pltpu.roll(mod, r*64) places under target j (jnp.roll semantics).
    #   Rlast : replicate last_w lane j into lanes j*64..j*64+63.
    #   G  : 16x16 group-of-4 indicator for in-place grouped softmax.
    R2 = np.zeros((MM, REP), np.float32)
    for r in range(M):
        for j in range(M):
            pidx = j * M + ((j - r) % M)
            R2[pidx, r * SLAB + j * MODULE_HIDDEN:
                     r * SLAB + (j + 1) * MODULE_HIDDEN] = 1.0
    Rlast = np.zeros((MM, SLAB), np.float32)
    for j in range(M):
        Rlast[j, j * MODULE_HIDDEN:(j + 1) * MODULE_HIDDEN] = 1.0
    gi = np.arange(MM)
    G = (gi[:, None] // M == gi[None, :] // M).astype(np.float32)

    return [bf(p['bW0']), bf(p['bW1']), bf(p['eW']), bf(p['gfW']),
            bf(gwW), f(gwb), bf(cC), f(b64),
            bf(W0c), f(b0c), bf(Wbd), f(bbd),
            bf(lW2), f(lb2),
            bf(jnp.asarray(R2)), bf(jnp.asarray(Rlast)), bf(jnp.asarray(G))]


# --------------------------------- kernel ----------------------------------
def mgccn_kernel(x_ref, em_ref, bW0, bW1, eW, gfW, gwW, gwb, cC, b64,
                 W0c, b0c, Wbd, bbd, lW2, lb2, R2, Rlast, G, out_ref):
    bf16 = jnp.bfloat16
    f32 = jnp.float32
    relu = lambda v: jnp.maximum(v, 0.0)
    H = GATING_HIDDEN

    def bdot(a, w):
        # bf16 MXU matmul, f32 accumulation (no f32 multi-pass emulation).
        return jnp.dot(a.astype(bf16), w, preferred_element_type=f32)

    x = x_ref[...]
    em = em_ref[...]

    # ---- base MLP (null last activation) and embedding base ----
    h = relu(bdot(x, bW0[...]) + b64[0])
    base_out = bdot(h, bW1[...]) + b64[1]
    emb = bdot(em, eW[...]) + b64[2]
    emb = emb * base_out                     # cond_ob=True
    out = relu(base_out)

    # ---- gating trunk ----
    emb = relu(emb)
    for k in range(NUM_GATING_LAYERS - 1):
        emb = relu(bdot(emb, gfW[k]) + b64[3 + k])
    emb = bdot(emb, gfW[NUM_GATING_LAYERS - 1]) + b64[3 + NUM_GATING_LAYERS - 1]

    Gm = G[...]
    inv = lambda d: pl.reciprocal(d, approx=True)   # EUP slot, off the VALU path

    def group_softmax(raw):
        # softmax over each contiguous group of M lanes, in place on the flat
        # (TB,16) layout.  Subtracting the global row max is exact math; the
        # per-lane group sums come from a 16x16 indicator matmul.
        # (Known fragility: if one group's logits sit ~80 below the row max its
        #  exps underflow; impossible at init-scale gating logits used here.)
        m = jnp.max(raw, axis=-1, keepdims=True)
        e = jnp.exp(raw - m)
        return e * inv(bdot(e, Gm))

    # ---- cascaded conditional gating weights ----
    # Each softmax weight sm_t goes through ONE matmul against its stacked
    # future cond-fc blocks (cC[t]); cond layer c then adds the 64-lane slice
    # at offset 64*(c-t) of every available partial (aligned value slices).
    sm0 = group_softmax(bdot(relu(emb), gwW[0]) + gwb[0])          # (TB,16)
    sms = [sm0]
    partials = [bdot(sm0, cC[0])]                                   # (TB,192)

    for c in range(L - 2):                      # cond_fc_{c+1}
        lin = b64[5 + c]
        for t in range(c + 1):
            lin = lin + partials[t][:, (c - t) * H:(c - t + 1) * H]
        cond = relu(lin * emb)
        sm = group_softmax(bdot(cond, gwW[c + 1]) + gwb[c + 1])
        sms.append(sm)
        partials.append(bdot(sm, cC[c + 1]))

    # last gating weight (4-way softmax via the -1e9 padded lanes)
    lin = b64[5 + (L - 2)]
    for t in range(L - 1):
        lin = lin + partials[t][:, (L - 2 - t) * H:(L - 2 - t + 1) * H]
    cond = relu(lin * emb)
    rawL = bdot(cond, gwW[L - 1]) + gwb[L - 1]       # lanes >= M carry -1e9
    mL = jnp.max(rawL, axis=-1, keepdims=True)
    eL = jnp.exp(rawL - mL)
    last_w = eL * inv(jnp.sum(eL, axis=-1, keepdims=True))   # (TB,16), lanes>=M == 0

    # ---- module cascade: one fused matmul per layer, mixing via XLU rolls ----
    R2m = R2[...]
    mod = bdot(out, W0c[...]) + b0c[...]             # (TB,256) slab [module k]
    for i in range(L - 1):
        w_all = bdot(sms[i], R2m)                    # (TB,1024): chunk r holds w[j,(j-r)%4]
        acc = mod * w_all[:, 0:SLAB]
        for r in range(1, M):
            acc = acc + (pltpu.roll(mod, shift=r * MODULE_HIDDEN, axis=1)
                         * w_all[:, r * SLAB:(r + 1) * SLAB])
        mixed = relu(acc)                            # (TB,256): sum over source k, f32
        mod = bdot(mixed, Wbd[i]) + bbd[i]           # block-diagonal fused Linears

    # final mix with last_w, then the output Linear (lane-dense, 128 wide)
    last_rep = bdot(last_w, Rlast[...])              # (TB,256) replicated last_w
    prodL = mod * last_rep
    v = prodL[:, :2 * MODULE_HIDDEN] + prodL[:, 2 * MODULE_HIDDEN:]   # (TB,128)
    accf = relu(v + pltpu.roll(v, shift=MODULE_HIDDEN, axis=1))       # dup halves
    out_ref[...] = bdot(accf, lW2[...]) + lb2[...]


# -------------------------------- wrapper -----------------------------------
def run_pallas(packed, x, em):
    batch = x.shape[0]
    # Single grid step at small batch: the problem is latency-/DMA-prologue-
    # bound, so splitting across TensorCores (v7x) only duplicates the weight
    # DMA.  Large batches grid over 128-row tiles so the constant-index weight
    # blocks are fetched once and revisited across steps.
    tb = batch if batch <= 128 else (128 if batch % 128 == 0 else batch)
    assert batch % tb == 0

    def batch_spec(arr):
        rest = tuple(arr.shape[1:])
        nz = len(rest)
        return pl.BlockSpec((tb,) + rest, lambda i, nz=nz: (i,) + (0,) * nz)

    def rep_spec(arr):
        nd = arr.ndim
        return pl.BlockSpec(tuple(arr.shape), lambda i, nd=nd: (0,) * nd)

    in_specs = [batch_spec(x), batch_spec(em)] + [rep_spec(a) for a in packed]
    out_spec = pl.BlockSpec((tb, OUT_PAD), lambda i: (i, 0))

    out_pad = pl.pallas_call(
        mgccn_kernel,
        out_shape=jax.ShapeDtypeStruct((batch, OUT_PAD), jnp.float32),
        grid=(batch // tb,),
        in_specs=in_specs,
        out_specs=out_spec,
        compiler_params=pltpu.CompilerParams(
            dimension_semantics=("parallel",)),
    )(x, em, *packed)
    return out_pad[:, :OUT_SHAPE]


# --------------------------- pure-JAX reference ------------------------------
def reference(p, x, em):
    relu = lambda v: jnp.maximum(v, 0.0)
    Bn = x.shape[0]
    h = relu(x @ p['bW0'] + p['bb0'])
    base_out = h @ p['bW1'] + p['bb1']
    embedding = em @ p['eW'] + p['eb']
    embedding = embedding * base_out
    out = relu(base_out)
    embedding = relu(embedding)
    for k in range(NUM_GATING_LAYERS - 1):
        embedding = relu(embedding @ p['gfW'][k] + p['gfb'][k])
    embedding = embedding @ p['gfW'][-1] + p['gfb'][-1]

    weights, flats = [], []
    raw = relu(embedding) @ p['gwW'][0] + p['gwb'][0]
    sm = jax.nn.softmax(raw.reshape(Bn, M, M), axis=-1)
    weights.append(sm); flats.append(sm.reshape(Bn, MM))
    for c in range(L - 2):
        cond_in = jnp.concatenate(flats, axis=-1)
        w_c = p['cW'][c][:(c + 1) * MM]
        cond = relu((cond_in @ w_c + p['cb'][c]) * embedding)
        raw = cond @ p['gwW'][c + 1] + p['gwb'][c + 1]
        sm = jax.nn.softmax(raw.reshape(Bn, M, M), axis=-1)
        weights.append(sm); flats.append(sm.reshape(Bn, MM))
    cond_in = jnp.concatenate(flats, axis=-1)
    cond = relu((cond_in @ p['cW'][L - 2] + p['cb'][L - 2]) * embedding)
    last_w = jax.nn.softmax(cond @ p['glW'] + p['glb'], axis=-1)

    mod = jnp.stack([out @ p['mW'][0, j] + p['mb'][0, j][0] for j in range(M)],
                    axis=-2)
    for i in range(L - 1):
        new = []
        for j in range(M):
            mix = relu(jnp.sum(mod * weights[i][:, j, :, None], axis=-2))
            new.append(mix @ p['mW'][i + 1, j] + p['mb'][i + 1, j][0])
        mod = jnp.stack(new, axis=-2)
    o = relu(jnp.sum(mod * last_w[:, :, None], axis=-2))
    return o @ p['lW'] + p['lb']


# ----------------------------------- main ------------------------------------
if __name__ == "__main__":
    key = jax.random.PRNGKey(0)
    kp, kx, ke = jax.random.split(key, 3)
    params = init_params(kp)
    x = jax.random.normal(kx, (B, IN_SHAPE), jnp.float32)
    em = jax.random.normal(ke, (B, EM_IN), jnp.float32)

    packed = pack_params(params)

    out = jax.block_until_ready(run_pallas(packed, x, em))
    ref = jax.block_until_ready(reference(params, x, em))

    assert out.shape == (B, OUT_SHAPE)
    o_np, r_np = np.asarray(out), np.asarray(ref)
    if not np.allclose(o_np, r_np, rtol=5e-2, atol=1.5e-3):
        err = float(np.max(np.abs(o_np - r_np)))
        raise AssertionError(f"kernel/reference mismatch, max abs err = {err}")
    print("KERNEL_OK")
</pallas_src>

<mosaic_0001>
module attributes {stable_mosaic.version = 11 : i64} {
  func.func @mgccn_kernel(%arg0: i32, %arg1: memref<16x32xf32, #tpu.memory_space<vmem>>, %arg2: memref<16x16xf32, #tpu.memory_space<vmem>>, %arg3: memref<32x64xbf16, #tpu.memory_space<vmem>>, %arg4: memref<64x64xbf16, #tpu.memory_space<vmem>>, %arg5: memref<16x64xbf16, #tpu.memory_space<vmem>>, %arg6: memref<2x64x64xbf16, #tpu.memory_space<vmem>>, %arg7: memref<4x64x16xbf16, #tpu.memory_space<vmem>>, %arg8: memref<4x1x16xf32, #tpu.memory_space<vmem>>, %arg9: memref<3x16x192xbf16, #tpu.memory_space<vmem>>, %arg10: memref<8x1x64xf32, #tpu.memory_space<vmem>>, %arg11: memref<64x256xbf16, #tpu.memory_space<vmem>>, %arg12: memref<1x256xf32, #tpu.memory_space<vmem>>, %arg13: memref<3x256x256xbf16, #tpu.memory_space<vmem>>, %arg14: memref<3x1x256xf32, #tpu.memory_space<vmem>>, %arg15: memref<128x128xbf16, #tpu.memory_space<vmem>>, %arg16: memref<1x128xf32, #tpu.memory_space<vmem>>, %arg17: memref<16x1024xbf16, #tpu.memory_space<vmem>>, %arg18: memref<16x256xbf16, #tpu.memory_space<vmem>>, %arg19: memref<16x16xbf16, #tpu.memory_space<vmem>>, %arg20: memref<16x128xf32, #tpu.memory_space<vmem>>) attributes {dimension_semantics = [#tpu.dimension_semantics<parallel>], iteration_bounds = array<i64: 1>, scalar_prefetch = 0 : i64, scratch_operands = 0 : i64, tpu.core_type = #tpu.core_type<tc>, window_params = [{transform_indices = @transform_0, window_bounds = array<i64: 16, 32>}, {transform_indices = @transform_1, window_bounds = array<i64: 16, 16>}, {pipeline_mode = #tpu.pipeline_mode<synchronous>, transform_indices = @transform_2, window_bounds = array<i64: 32, 64>}, {pipeline_mode = #tpu.pipeline_mode<synchronous>, transform_indices = @transform_3, window_bounds = array<i64: 64, 64>}, {pipeline_mode = #tpu.pipeline_mode<synchronous>, transform_indices = @transform_4, window_bounds = array<i64: 16, 64>}, {pipeline_mode = #tpu.pipeline_mode<synchronous>, transform_indices = @transform_5, window_bounds = array<i64: 2, 64, 64>}, {pipeline_mode = #tpu.pipeline_mode<synchronous>, transform_indices = @transform_6, window_bounds = array<i64: 4, 64, 16>}, {pipeline_mode = #tpu.pipeline_mode<synchronous>, transform_indices = @transform_7, window_bounds = array<i64: 4, 1, 16>}, {pipeline_mode = #tpu.pipeline_mode<synchronous>, transform_indices = @transform_8, window_bounds = array<i64: 3, 16, 192>}, {pipeline_mode = #tpu.pipeline_mode<synchronous>, transform_indices = @transform_9, window_bounds = array<i64: 8, 1, 64>}, {pipeline_mode = #tpu.pipeline_mode<synchronous>, transform_indices = @transform_10, window_bounds = array<i64: 64, 256>}, {pipeline_mode = #tpu.pipeline_mode<synchronous>, transform_indices = @transform_11, window_bounds = array<i64: 1, 256>}, {pipeline_mode = #tpu.pipeline_mode<synchronous>, transform_indices = @transform_12, window_bounds = array<i64: 3, 256, 256>}, {pipeline_mode = #tpu.pipeline_mode<synchronous>, transform_indices = @transform_13, window_bounds = array<i64: 3, 1, 256>}, {pipeline_mode = #tpu.pipeline_mode<synchronous>, transform_indices = @transform_14, window_bounds = array<i64: 128, 128>}, {pipeline_mode = #tpu.pipeline_mode<synchronous>, transform_indices = @transform_15, window_bounds = array<i64: 1, 128>}, {pipeline_mode = #tpu.pipeline_mode<synchronous>, transform_indices = @transform_16, window_bounds = array<i64: 16, 1024>}, {pipeline_mode = #tpu.pipeline_mode<synchronous>, transform_indices = @transform_17, window_bounds = array<i64: 16, 256>}, {pipeline_mode = #tpu.pipeline_mode<synchronous>, transform_indices = @transform_18, window_bounds = array<i64: 16, 16>}, {transform_indices = @transform_19, window_bounds = array<i64: 16, 128>}]} {
    %c0 = arith.constant 0 : index
    %c0_0 = arith.constant 0 : index
    %0 = vector.load %arg1[%c0, %c0_0] : memref<16x32xf32, #tpu.memory_space<vmem>>, vector<16x32xf32>
    %c0_1 = arith.constant 0 : index
    %c0_2 = arith.constant 0 : index
    %1 = vector.load %arg2[%c0_1, %c0_2] : memref<16x16xf32, #tpu.memory_space<vmem>>, vector<16x16xf32>
    %c0_3 = arith.constant 0 : index
    %c0_4 = arith.constant 0 : index
    %2 = vector.load %arg3[%c0_3, %c0_4] : memref<32x64xbf16, #tpu.memory_space<vmem>>, vector<32x64xbf16>
    %3 = arith.truncf %0 : vector<16x32xf32> to vector<16x32xbf16>
    %cst = arith.constant dense<0.000000e+00> : vector<16x64xf32>
    %4 = tpu.matmul %3, %2, %cst {dimension_numbers = #tpu.dot_dimension_numbers<[1], [0], [0], [1], [0, 0, 1, 1], [], []>} : vector<16x32xbf16>, vector<32x64xbf16>, vector<16x64xf32> -> vector<16x64xf32>
    %c0_5 = arith.constant 0 : index
    %c0_6 = arith.constant 0 : index
    %c0_7 = arith.constant 0 : index
    %5 = vector.load %arg10[%c0_5, %c0_6, %c0_7] : memref<8x1x64xf32, #tpu.memory_space<vmem>>, vector<1x1x64xf32>
    %6 = vector.shape_cast %5 : vector<1x1x64xf32> to vector<1x64xf32>
    %7 = vector.broadcast %6 : vector<1x64xf32> to vector<16x64xf32>
    %8 = arith.addf %4, %7 : vector<16x64xf32>
    %cst_8 = arith.constant 0.000000e+00 : f32
    %9 = vector.broadcast %cst_8 : f32 to vector<16x64xf32>
    %10 = arith.maximumf %8, %9 : vector<16x64xf32>
    %c0_9 = arith.constant 0 : index
    %c0_10 = arith.constant 0 : index
    %11 = vector.load %arg4[%c0_9, %c0_10] : memref<64x64xbf16, #tpu.memory_space<vmem>>, vector<64x64xbf16>
    %12 = arith.truncf %10 : vector<16x64xf32> to vector<16x64xbf16>
    %cst_11 = arith.constant dense<0.000000e+00> : vector<16x64xf32>
    %13 = tpu.matmul %12, %11, %cst_11 {dimension_numbers = #tpu.dot_dimension_numbers<[1], [0], [0], [1], [0, 0, 1, 1], [], []>} : vector<16x64xbf16>, vector<64x64xbf16>, vector<16x64xf32> -> vector<16x64xf32>
    %c1 = arith.constant 1 : index
    %c0_12 = arith.constant 0 : index
    %c0_13 = arith.constant 0 : index
    %14 = vector.load %arg10[%c1, %c0_12, %c0_13] : memref<8x1x64xf32, #tpu.memory_space<vmem>>, vector<1x1x64xf32>
    %15 = vector.shape_cast %14 : vector<1x1x64xf32> to vector<1x64xf32>
    %16 = vector.broadcast %15 : vector<1x64xf32> to vector<16x64xf32>
    %17 = arith.addf %13, %16 : vector<16x64xf32>
    %c0_14 = arith.constant 0 : index
    %c0_15 = arith.constant 0 : index
    %18 = vector.load %arg5[%c0_14, %c0_15] : memref<16x64xbf16, #tpu.memory_space<vmem>>, vector<16x64xbf16>
    %19 = arith.truncf %1 : vector<16x16xf32> to vector<16x16xbf16>
    %cst_16 = arith.constant dense<0.000000e+00> : vector<16x64xf32>
    %20 = tpu.matmul %19, %18, %cst_16 {dimension_numbers = #tpu.dot_dimension_numbers<[1], [0], [0], [1], [0, 0, 1, 1], [], []>} : vector<16x16xbf16>, vector<16x64xbf16>, vector<16x64xf32> -> vector<16x64xf32>
    %c2 = arith.constant 2 : index
    %c0_17 = arith.constant 0 : index
    %c0_18 = arith.constant 0 : index
    %21 = vector.load %arg10[%c2, %c0_17, %c0_18] : memref<8x1x64xf32, #tpu.memory_space<vmem>>, vector<1x1x64xf32>
    %22 = vector.shape_cast %21 : vector<1x1x64xf32> to vector<1x64xf32>
    %23 = vector.broadcast %22 : vector<1x64xf32> to vector<16x64xf32>
    %24 = arith.addf %20, %23 : vector<16x64xf32>
    %25 = arith.mulf %24, %17 : vector<16x64xf32>
    %cst_19 = arith.constant 0.000000e+00 : f32
    %26 = vector.broadcast %cst_19 : f32 to vector<16x64xf32>
    %27 = arith.maximumf %17, %26 : vector<16x64xf32>
    %cst_20 = arith.constant 0.000000e+00 : f32
    %28 = vector.broadcast %cst_20 : f32 to vector<16x64xf32>
    %29 = arith.maximumf %25, %28 : vector<16x64xf32>
    %c0_21 = arith.constant 0 : index
    %c0_22 = arith.constant 0 : index
    %c0_23 = arith.constant 0 : index
    %30 = vector.load %arg6[%c0_21, %c0_22, %c0_23] : memref<2x64x64xbf16, #tpu.memory_space<vmem>>, vector<1x64x64xbf16>
    %31 = vector.shape_cast %30 : vector<1x64x64xbf16> to vector<64x64xbf16>
    %32 = arith.truncf %29 : vector<16x64xf32> to vector<16x64xbf16>
    %cst_24 = arith.constant dense<0.000000e+00> : vector<16x64xf32>
    %33 = tpu.matmul %32, %31, %cst_24 {dimension_numbers = #tpu.dot_dimension_numbers<[1], [0], [0], [1], [0, 0, 1, 1], [], []>} : vector<16x64xbf16>, vector<64x64xbf16>, vector<16x64xf32> -> vector<16x64xf32>
    %c3 = arith.constant 3 : index
    %c0_25 = arith.constant 0 : index
    %c0_26 = arith.constant 0 : index
    %34 = vector.load %arg10[%c3, %c0_25, %c0_26] : memref<8x1x64xf32, #tpu.memory_space<vmem>>, vector<1x1x64xf32>
    %35 = vector.shape_cast %34 : vector<1x1x64xf32> to vector<1x64xf32>
    %36 = vector.broadcast %35 : vector<1x64xf32> to vector<16x64xf32>
    %37 = arith.addf %33, %36 : vector<16x64xf32>
    %cst_27 = arith.constant 0.000000e+00 : f32
    %38 = vector.broadcast %cst_27 : f32 to vector<16x64xf32>
    %39 = arith.maximumf %37, %38 : vector<16x64xf32>
    %c1_28 = arith.constant 1 : index
    %c0_29 = arith.constant 0 : index
    %c0_30 = arith.constant 0 : index
    %40 = vector.load %arg6[%c1_28, %c0_29, %c0_30] : memref<2x64x64xbf16, #tpu.memory_space<vmem>>, vector<1x64x64xbf16>
    %41 = vector.shape_cast %40 : vector<1x64x64xbf16> to vector<64x64xbf16>
    %42 = arith.truncf %39 : vector<16x64xf32> to vector<16x64xbf16>
    %cst_31 = arith.constant dense<0.000000e+00> : vector<16x64xf32>
    %43 = tpu.matmul %42, %41, %cst_31 {dimension_numbers = #tpu.dot_dimension_numbers<[1], [0], [0], [1], [0, 0, 1, 1], [], []>} : vector<16x64xbf16>, vector<64x64xbf16>, vector<16x64xf32> -> vector<16x64xf32>
    %c4 = arith.constant 4 : index
    %c0_32 = arith.constant 0 : index
    %c0_33 = arith.constant 0 : index
    %44 = vector.load %arg10[%c4, %c0_32, %c0_33] : memref<8x1x64xf32, #tpu.memory_space<vmem>>, vector<1x1x64xf32>
    %45 = vector.shape_cast %44 : vector<1x1x64xf32> to vector<1x64xf32>
    %46 = vector.broadcast %45 : vector<1x64xf32> to vector<16x64xf32>
    %47 = arith.addf %43, %46 : vector<16x64xf32>
    %c0_34 = arith.constant 0 : index
    %c0_35 = arith.constant 0 : index
    %48 = vector.load %arg19[%c0_34, %c0_35] : memref<16x16xbf16, #tpu.memory_space<vmem>>, vector<16x16xbf16>
    %cst_36 = arith.constant 0.000000e+00 : f32
    %49 = vector.broadcast %cst_36 : f32 to vector<16x64xf32>
    %50 = arith.maximumf %47, %49 : vector<16x64xf32>
    %c0_37 = arith.constant 0 : index
    %c0_38 = arith.constant 0 : index
    %c0_39 = arith.constant 0 : index
    %51 = vector.load %arg7[%c0_37, %c0_38, %c0_39] : memref<4x64x16xbf16, #tpu.memory_space<vmem>>, vector<1x64x16xbf16>
    %52 = vector.shape_cast %51 : vector<1x64x16xbf16> to vector<64x16xbf16>
    %53 = arith.truncf %50 : vector<16x64xf32> to vector<16x64xbf16>
    %cst_40 = arith.constant dense<0.000000e+00> : vector<16x16xf32>
    %54 = tpu.matmul %53, %52, %cst_40 {dimension_numbers = #tpu.dot_dimension_numbers<[1], [0], [0], [1], [0, 0, 1, 1], [], []>} : vector<16x64xbf16>, vector<64x16xbf16>, vector<16x16xf32> -> vector<16x16xf32>
    %c0_41 = arith.constant 0 : index
    %c0_42 = arith.constant 0 : index
    %c0_43 = arith.constant 0 : index
    %55 = vector.load %arg8[%c0_41, %c0_42, %c0_43] : memref<4x1x16xf32, #tpu.memory_space<vmem>>, vector<1x1x16xf32>
    %56 = vector.shape_cast %55 : vector<1x1x16xf32> to vector<1x16xf32>
    %57 = vector.broadcast %56 : vector<1x16xf32> to vector<16x16xf32>
    %58 = arith.addf %54, %57 : vector<16x16xf32>
    %cst_44 = arith.constant dense<0xFF800000> : vector<16xf32>
    %59 = vector.multi_reduction <maximumf>, %58, %cst_44 [1] : vector<16x16xf32> to vector<16xf32>
    %60 = vector.shape_cast %59 : vector<16xf32> to vector<16x1xf32>
    %61 = vector.broadcast %60 : vector<16x1xf32> to vector<16x16xf32>
    %62 = arith.subf %58, %61 : vector<16x16xf32>
    %63 = math.exp %62 : vector<16x16xf32>
    %64 = arith.truncf %63 : vector<16x16xf32> to vector<16x16xbf16>
    %cst_45 = arith.constant dense<0.000000e+00> : vector<16x16xf32>
    %65 = tpu.matmul %64, %48, %cst_45 {dimension_numbers = #tpu.dot_dimension_numbers<[1], [0], [0], [1], [0, 0, 1, 1], [], []>} : vector<16x16xbf16>, vector<16x16xbf16>, vector<16x16xf32> -> vector<16x16xf32>
    %66 = tpu.reciprocal %65 {approx = true} : vector<16x16xf32> -> vector<16x16xf32>
    %67 = arith.mulf %63, %66 : vector<16x16xf32>
    %c0_46 = arith.constant 0 : index
    %c0_47 = arith.constant 0 : index
    %c0_48 = arith.constant 0 : index
    %68 = vector.load %arg9[%c0_46, %c0_47, %c0_48] : memref<3x16x192xbf16, #tpu.memory_space<vmem>>, vector<1x16x192xbf16>
    %69 = vector.shape_cast %68 : vector<1x16x192xbf16> to vector<16x192xbf16>
    %70 = arith.truncf %67 : vector<16x16xf32> to vector<16x16xbf16>
    %cst_49 = arith.constant dense<0.000000e+00> : vector<16x192xf32>
    %71 = tpu.matmul %70, %69, %cst_49 {dimension_numbers = #tpu.dot_dimension_numbers<[1], [0], [0], [1], [0, 0, 1, 1], [], []>} : vector<16x16xbf16>, vector<16x192xbf16>, vector<16x192xf32> -> vector<16x192xf32>
    %c5 = arith.constant 5 : index
    %c0_50 = arith.constant 0 : index
    %c0_51 = arith.constant 0 : index
    %72 = vector.load %arg10[%c5, %c0_50, %c0_51] : memref<8x1x64xf32, #tpu.memory_space<vmem>>, vector<1x1x64xf32>
    %73 = vector.shape_cast %72 : vector<1x1x64xf32> to vector<1x64xf32>
    %74 = vector.extract_strided_slice %71 {offsets = [0, 0], sizes = [16, 64], strides = [1, 1]} : vector<16x192xf32> to vector<16x64xf32>
    %75 = vector.broadcast %73 : vector<1x64xf32> to vector<16x64xf32>
    %76 = arith.addf %75, %74 : vector<16x64xf32>
    %77 = arith.mulf %76, %47 : vector<16x64xf32>
    %cst_52 = arith.constant 0.000000e+00 : f32
    %78 = vector.broadcast %cst_52 : f32 to vector<16x64xf32>
    %79 = arith.maximumf %77, %78 : vector<16x64xf32>
    %c1_53 = arith.constant 1 : index
    %c0_54 = arith.constant 0 : index
    %c0_55 = arith.constant 0 : index
    %80 = vector.load %arg7[%c1_53, %c0_54, %c0_55] : memref<4x64x16xbf16, #tpu.memory_space<vmem>>, vector<1x64x16xbf16>
    %81 = vector.shape_cast %80 : vector<1x64x16xbf16> to vector<64x16xbf16>
    %82 = arith.truncf %79 : vector<16x64xf32> to vector<16x64xbf16>
    %cst_56 = arith.constant dense<0.000000e+00> : vector<16x16xf32>
    %83 = tpu.matmul %82, %81, %cst_56 {dimension_numbers = #tpu.dot_dimension_numbers<[1], [0], [0], [1], [0, 0, 1, 1], [], []>} : vector<16x64xbf16>, vector<64x16xbf16>, vector<16x16xf32> -> vector<16x16xf32>
    %c1_57 = arith.constant 1 : index
    %c0_58 = arith.constant 0 : index
    %c0_59 = arith.constant 0 : index
    %84 = vector.load %arg8[%c1_57, %c0_58, %c0_59] : memref<4x1x16xf32, #tpu.memory_space<vmem>>, vector<1x1x16xf32>
    %85 = vector.shape_cast %84 : vector<1x1x16xf32> to vector<1x16xf32>
    %86 = vector.broadcast %85 : vector<1x16xf32> to vector<16x16xf32>
    %87 = arith.addf %83, %86 : vector<16x16xf32>
    %cst_60 = arith.constant dense<0xFF800000> : vector<16xf32>
    %88 = vector.multi_reduction <maximumf>, %87, %cst_60 [1] : vector<16x16xf32> to vector<16xf32>
    %89 = vector.shape_cast %88 : vector<16xf32> to vector<16x1xf32>
    %90 = vector.broadcast %89 : vector<16x1xf32> to vector<16x16xf32>
    %91 = arith.subf %87, %90 : vector<16x16xf32>
    %92 = math.exp %91 : vector<16x16xf32>
    %93 = arith.truncf %92 : vector<16x16xf32> to vector<16x16xbf16>
    %cst_61 = arith.constant dense<0.000000e+00> : vector<16x16xf32>
    %94 = tpu.matmul %93, %48, %cst_61 {dimension_numbers = #tpu.dot_dimension_numbers<[1], [0], [0], [1], [0, 0, 1, 1], [], []>} : vector<16x16xbf16>, vector<16x16xbf16>, vector<16x16xf32> -> vector<16x16xf32>
    %95 = tpu.reciprocal %94 {approx = true} : vector<16x16xf32> -> vector<16x16xf32>
    %96 = arith.mulf %92, %95 : vector<16x16xf32>
    %c1_62 = arith.constant 1 : index
    %c0_63 = arith.constant 0 : index
    %c0_64 = arith.constant 0 : index
    %97 = vector.load %arg9[%c1_62, %c0_63, %c0_64] : memref<3x16x192xbf16, #tpu.memory_space<vmem>>, vector<1x16x192xbf16>
    %98 = vector.shape_cast %97 : vector<1x16x192xbf16> to vector<16x192xbf16>
    %99 = arith.truncf %96 : vector<16x16xf32> to vector<16x16xbf16>
    %cst_65 = arith.constant dense<0.000000e+00> : vector<16x192xf32>
    %100 = tpu.matmul %99, %98, %cst_65 {dimension_numbers = #tpu.dot_dimension_numbers<[1], [0], [0], [1], [0, 0, 1, 1], [], []>} : vector<16x16xbf16>, vector<16x192xbf16>, vector<16x192xf32> -> vector<16x192xf32>
    %c6 = arith.constant 6 : index
    %c0_66 = arith.constant 0 : index
    %c0_67 = arith.constant 0 : index
    %101 = vector.load %arg10[%c6, %c0_66, %c0_67] : memref<8x1x64xf32, #tpu.memory_space<vmem>>, vector<1x1x64xf32>
    %102 = vector.shape_cast %101 : vector<1x1x64xf32> to vector<1x64xf32>
    %103 = vector.extract_strided_slice %71 {offsets = [0, 64], sizes = [16, 64], strides = [1, 1]} : vector<16x192xf32> to vector<16x64xf32>
    %104 = vector.broadcast %102 : vector<1x64xf32> to vector<16x64xf32>
    %105 = arith.addf %104, %103 : vector<16x64xf32>
    %106 = vector.extract_strided_slice %100 {offsets = [0, 0], sizes = [16, 64], strides = [1, 1]} : vector<16x192xf32> to vector<16x64xf32>
    %107 = arith.addf %105, %106 : vector<16x64xf32>
    %108 = arith.mulf %107, %47 : vector<16x64xf32>
    %cst_68 = arith.constant 0.000000e+00 : f32
    %109 = vector.broadcast %cst_68 : f32 to vector<16x64xf32>
    %110 = arith.maximumf %108, %109 : vector<16x64xf32>
    %c2_69 = arith.constant 2 : index
    %c0_70 = arith.constant 0 : index
    %c0_71 = arith.constant 0 : index
    %111 = vector.load %arg7[%c2_69, %c0_70, %c0_71] : memref<4x64x16xbf16, #tpu.memory_space<vmem>>, vector<1x64x16xbf16>
    %112 = vector.shape_cast %111 : vector<1x64x16xbf16> to vector<64x16xbf16>
    %113 = arith.truncf %110 : vector<16x64xf32> to vector<16x64xbf16>
    %cst_72 = arith.constant dense<0.000000e+00> : vector<16x16xf32>
    %114 = tpu.matmul %113, %112, %cst_72 {dimension_numbers = #tpu.dot_dimension_numbers<[1], [0], [0], [1], [0, 0, 1, 1], [], []>} : vector<16x64xbf16>, vector<64x16xbf16>, vector<16x16xf32> -> vector<16x16xf32>
    %c2_73 = arith.constant 2 : index
    %c0_74 = arith.constant 0 : index
    %c0_75 = arith.constant 0 : index
    %115 = vector.load %arg8[%c2_73, %c0_74, %c0_75] : memref<4x1x16xf32, #tpu.memory_space<vmem>>, vector<1x1x16xf32>
    %116 = vector.shape_cast %115 : vector<1x1x16xf32> to vector<1x16xf32>
    %117 = vector.broadcast %116 : vector<1x16xf32> to vector<16x16xf32>
    %118 = arith.addf %114, %117 : vector<16x16xf32>
    %cst_76 = arith.constant dense<0xFF800000> : vector<16xf32>
    %119 = vector.multi_reduction <maximumf>, %118, %cst_76 [1] : vector<16x16xf32> to vector<16xf32>
    %120 = vector.shape_cast %119 : vector<16xf32> to vector<16x1xf32>
    %121 = vector.broadcast %120 : vector<16x1xf32> to vector<16x16xf32>
    %122 = arith.subf %118, %121 : vector<16x16xf32>
    %123 = math.exp %122 : vector<16x16xf32>
    %124 = arith.truncf %123 : vector<16x16xf32> to vector<16x16xbf16>
    %cst_77 = arith.constant dense<0.000000e+00> : vector<16x16xf32>
    %125 = tpu.matmul %124, %48, %cst_77 {dimension_numbers = #tpu.dot_dimension_numbers<[1], [0], [0], [1], [0, 0, 1, 1], [], []>} : vector<16x16xbf16>, vector<16x16xbf16>, vector<16x16xf32> -> vector<16x16xf32>
    %126 = tpu.reciprocal %125 {approx = true} : vector<16x16xf32> -> vector<16x16xf32>
    %127 = arith.mulf %123, %126 : vector<16x16xf32>
    %c2_78 = arith.constant 2 : index
    %c0_79 = arith.constant 0 : index
    %c0_80 = arith.constant 0 : index
    %128 = vector.load %arg9[%c2_78, %c0_79, %c0_80] : memref<3x16x192xbf16, #tpu.memory_space<vmem>>, vector<1x16x192xbf16>
    %129 = vector.shape_cast %128 : vector<1x16x192xbf16> to vector<16x192xbf16>
    %130 = arith.truncf %127 : vector<16x16xf32> to vector<16x16xbf16>
    %cst_81 = arith.constant dense<0.000000e+00> : vector<16x192xf32>
    %131 = tpu.matmul %130, %129, %cst_81 {dimension_numbers = #tpu.dot_dimension_numbers<[1], [0], [0], [1], [0, 0, 1, 1], [], []>} : vector<16x16xbf16>, vector<16x192xbf16>, vector<16x192xf32> -> vector<16x192xf32>
    %c7 = arith.constant 7 : index
    %c0_82 = arith.constant 0 : index
    %c0_83 = arith.constant 0 : index
    %132 = vector.load %arg10[%c7, %c0_82, %c0_83] : memref<8x1x64xf32, #tpu.memory_space<vmem>>, vector<1x1x64xf32>
    %133 = vector.shape_cast %132 : vector<1x1x64xf32> to vector<1x64xf32>
    %134 = vector.extract_strided_slice %71 {offsets = [0, 128], sizes = [16, 64], strides = [1, 1]} : vector<16x192xf32> to vector<16x64xf32>
    %135 = vector.broadcast %133 : vector<1x64xf32> to vector<16x64xf32>
    %136 = arith.addf %135, %134 : vector<16x64xf32>
    %137 = vector.extract_strided_slice %100 {offsets = [0, 64], sizes = [16, 64], strides = [1, 1]} : vector<16x192xf32> to vector<16x64xf32>
    %138 = arith.addf %136, %137 : vector<16x64xf32>
    %139 = vector.extract_strided_slice %131 {offsets = [0, 0], sizes = [16, 64], strides = [1, 1]} : vector<16x192xf32> to vector<16x64xf32>
    %140 = arith.addf %138, %139 : vector<16x64xf32>
    %141 = arith.mulf %140, %47 : vector<16x64xf32>
    %cst_84 = arith.constant 0.000000e+00 : f32
    %142 = vector.broadcast %cst_84 : f32 to vector<16x64xf32>
    %143 = arith.maximumf %141, %142 : vector<16x64xf32>
    %c3_85 = arith.constant 3 : index
    %c0_86 = arith.constant 0 : index
    %c0_87 = arith.constant 0 : index
    %144 = vector.load %arg7[%c3_85, %c0_86, %c0_87] : memref<4x64x16xbf16, #tpu.memory_space<vmem>>, vector<1x64x16xbf16>
    %145 = vector.shape_cast %144 : vector<1x64x16xbf16> to vector<64x16xbf16>
    %146 = arith.truncf %143 : vector<16x64xf32> to vector<16x64xbf16>
    %cst_88 = arith.constant dense<0.000000e+00> : vector<16x16xf32>
    %147 = tpu.matmul %146, %145, %cst_88 {dimension_numbers = #tpu.dot_dimension_numbers<[1], [0], [0], [1], [0, 0, 1, 1], [], []>} : vector<16x64xbf16>, vector<64x16xbf16>, vector<16x16xf32> -> vector<16x16xf32>
    %c3_89 = arith.constant 3 : index
    %c0_90 = arith.constant 0 : index
    %c0_91 = arith.constant 0 : index
    %148 = vector.load %arg8[%c3_89, %c0_90, %c0_91] : memref<4x1x16xf32, #tpu.memory_space<vmem>>, vector<1x1x16xf32>
    %149 = vector.shape_cast %148 : vector<1x1x16xf32> to vector<1x16xf32>
    %150 = vector.broadcast %149 : vector<1x16xf32> to vector<16x16xf32>
    %151 = arith.addf %147, %150 : vector<16x16xf32>
    %cst_92 = arith.constant dense<0xFF800000> : vector<16xf32>
    %152 = vector.multi_reduction <maximumf>, %151, %cst_92 [1] : vector<16x16xf32> to vector<16xf32>
    %153 = vector.shape_cast %152 : vector<16xf32> to vector<16x1xf32>
    %154 = vector.broadcast %153 : vector<16x1xf32> to vector<16x16xf32>
    %155 = arith.subf %151, %154 : vector<16x16xf32>
    %156 = math.exp %155 : vector<16x16xf32>
    %cst_93 = arith.constant dense<0.000000e+00> : vector<16xf32>
    %157 = vector.multi_reduction <add>, %156, %cst_93 [1] : vector<16x16xf32> to vector<16xf32>
    %158 = vector.shape_cast %157 : vector<16xf32> to vector<16x1xf32>
    %159 = tpu.reciprocal %158 {approx = true} : vector<16x1xf32> -> vector<16x1xf32>
    %160 = vector.broadcast %159 : vector<16x1xf32> to vector<16x16xf32>
    %161 = arith.mulf %156, %160 : vector<16x16xf32>
    %c0_94 = arith.constant 0 : index
    %c0_95 = arith.constant 0 : index
    %162 = vector.load %arg17[%c0_94, %c0_95] : memref<16x1024xbf16, #tpu.memory_space<vmem>>, vector<16x1024xbf16>
    %c0_96 = arith.constant 0 : index
    %c0_97 = arith.constant 0 : index
    %163 = vector.load %arg11[%c0_96, %c0_97] : memref<64x256xbf16, #tpu.memory_space<vmem>>, vector<64x256xbf16>
    %164 = arith.truncf %27 : vector<16x64xf32> to vector<16x64xbf16>
    %cst_98 = arith.constant dense<0.000000e+00> : vector<16x256xf32>
    %165 = tpu.matmul %164, %163, %cst_98 {dimension_numbers = #tpu.dot_dimension_numbers<[1], [0], [0], [1], [0, 0, 1, 1], [], []>} : vector<16x64xbf16>, vector<64x256xbf16>, vector<16x256xf32> -> vector<16x256xf32>
    %c0_99 = arith.constant 0 : index
    %c0_100 = arith.constant 0 : index
    %166 = vector.load %arg12[%c0_99, %c0_100] : memref<1x256xf32, #tpu.memory_space<vmem>>, vector<1x256xf32>
    %167 = vector.broadcast %166 : vector<1x256xf32> to vector<16x256xf32>
    %168 = arith.addf %165, %167 : vector<16x256xf32>
    %169 = arith.truncf %67 : vector<16x16xf32> to vector<16x16xbf16>
    %cst_101 = arith.constant dense<0.000000e+00> : vector<16x1024xf32>
    %170 = tpu.matmul %169, %162, %cst_101 {dimension_numbers = #tpu.dot_dimension_numbers<[1], [0], [0], [1], [0, 0, 1, 1], [], []>} : vector<16x16xbf16>, vector<16x1024xbf16>, vector<16x1024xf32> -> vector<16x1024xf32>
    %171 = vector.extract_strided_slice %170 {offsets = [0, 0], sizes = [16, 256], strides = [1, 1]} : vector<16x1024xf32> to vector<16x256xf32>
    %172 = arith.mulf %168, %171 : vector<16x256xf32>
    %c64_i32 = arith.constant 64 : i32
    %173 = tpu.dynamic_rotate %168 by %c64_i32 dim 1 : vector<16x256xf32>, i32 -> vector<16x256xf32>
    %174 = vector.extract_strided_slice %170 {offsets = [0, 256], sizes = [16, 256], strides = [1, 1]} : vector<16x1024xf32> to vector<16x256xf32>
    %175 = arith.mulf %173, %174 : vector<16x256xf32>
    %176 = arith.addf %172, %175 : vector<16x256xf32>
    %c128_i32 = arith.constant 128 : i32
    %177 = tpu.dynamic_rotate %168 by %c128_i32 dim 1 : vector<16x256xf32>, i32 -> vector<16x256xf32>
    %178 = vector.extract_strided_slice %170 {offsets = [0, 512], sizes = [16, 256], strides = [1, 1]} : vector<16x1024xf32> to vector<16x256xf32>
    %179 = arith.mulf %177, %178 : vector<16x256xf32>
    %180 = arith.addf %176, %179 : vector<16x256xf32>
    %c192_i32 = arith.constant 192 : i32
    %181 = tpu.dynamic_rotate %168 by %c192_i32 dim 1 : vector<16x256xf32>, i32 -> vector<16x256xf32>
    %182 = vector.extract_strided_slice %170 {offsets = [0, 768], sizes = [16, 256], strides = [1, 1]} : vector<16x1024xf32> to vector<16x256xf32>
    %183 = arith.mulf %181, %182 : vector<16x256xf32>
    %184 = arith.addf %180, %183 : vector<16x256xf32>
    %cst_102 = arith.constant 0.000000e+00 : f32
    %185 = vector.broadcast %cst_102 : f32 to vector<16x256xf32>
    %186 = arith.maximumf %184, %185 : vector<16x256xf32>
    %c0_103 = arith.constant 0 : index
    %c0_104 = arith.constant 0 : index
    %c0_105 = arith.constant 0 : index
    %187 = vector.load %arg13[%c0_103, %c0_104, %c0_105] : memref<3x256x256xbf16, #tpu.memory_space<vmem>>, vector<1x256x256xbf16>
    %188 = vector.shape_cast %187 : vector<1x256x256xbf16> to vector<256x256xbf16>
    %189 = arith.truncf %186 : vector<16x256xf32> to vector<16x256xbf16>
    %cst_106 = arith.constant dense<0.000000e+00> : vector<16x256xf32>
    %190 = tpu.matmul %189, %188, %cst_106 {dimension_numbers = #tpu.dot_dimension_numbers<[1], [0], [0], [1], [0, 0, 1, 1], [], []>} : vector<16x256xbf16>, vector<256x256xbf16>, vector<16x256xf32> -> vector<16x256xf32>
    %c0_107 = arith.constant 0 : index
    %c0_108 = arith.constant 0 : index
    %c0_109 = arith.constant 0 : index
    %191 = vector.load %arg14[%c0_107, %c0_108, %c0_109] : memref<3x1x256xf32, #tpu.memory_space<vmem>>, vector<1x1x256xf32>
    %192 = vector.shape_cast %191 : vector<1x1x256xf32> to vector<1x256xf32>
    %193 = vector.broadcast %192 : vector<1x256xf32> to vector<16x256xf32>
    %194 = arith.addf %190, %193 : vector<16x256xf32>
    %195 = arith.truncf %96 : vector<16x16xf32> to vector<16x16xbf16>
    %cst_110 = arith.constant dense<0.000000e+00> : vector<16x1024xf32>
    %196 = tpu.matmul %195, %162, %cst_110 {dimension_numbers = #tpu.dot_dimension_numbers<[1], [0], [0], [1], [0, 0, 1, 1], [], []>} : vector<16x16xbf16>, vector<16x1024xbf16>, vector<16x1024xf32> -> vector<16x1024xf32>
    %197 = vector.extract_strided_slice %196 {offsets = [0, 0], sizes = [16, 256], strides = [1, 1]} : vector<16x1024xf32> to vector<16x256xf32>
    %198 = arith.mulf %194, %197 : vector<16x256xf32>
    %c64_i32_111 = arith.constant 64 : i32
    %199 = tpu.dynamic_rotate %194 by %c64_i32_111 dim 1 : vector<16x256xf32>, i32 -> vector<16x256xf32>
    %200 = vector.extract_strided_slice %196 {offsets = [0, 256], sizes = [16, 256], strides = [1, 1]} : vector<16x1024xf32> to vector<16x256xf32>
    %201 = arith.mulf %199, %200 : vector<16x256xf32>
    %202 = arith.addf %198, %201 : vector<16x256xf32>
    %c128_i32_112 = arith.constant 128 : i32
    %203 = tpu.dynamic_rotate %194 by %c128_i32_112 dim 1 : vector<16x256xf32>, i32 -> vector<16x256xf32>
    %204 = vector.extract_strided_slice %196 {offsets = [0, 512], sizes = [16, 256], strides = [1, 1]} : vector<16x1024xf32> to vector<16x256xf32>
    %205 = arith.mulf %203, %204 : vector<16x256xf32>
    %206 = arith.addf %202, %205 : vector<16x256xf32>
    %c192_i32_113 = arith.constant 192 : i32
    %207 = tpu.dynamic_rotate %194 by %c192_i32_113 dim 1 : vector<16x256xf32>, i32 -> vector<16x256xf32>
    %208 = vector.extract_strided_slice %196 {offsets = [0, 768], sizes = [16, 256], strides = [1, 1]} : vector<16x1024xf32> to vector<16x256xf32>
    %209 = arith.mulf %207, %208 : vector<16x256xf32>
    %210 = arith.addf %206, %209 : vector<16x256xf32>
    %cst_114 = arith.constant 0.000000e+00 : f32
    %211 = vector.broadcast %cst_114 : f32 to vector<16x256xf32>
    %212 = arith.maximumf %210, %211 : vector<16x256xf32>
    %c1_115 = arith.constant 1 : index
    %c0_116 = arith.constant 0 : index
    %c0_117 = arith.constant 0 : index
    %213 = vector.load %arg13[%c1_115, %c0_116, %c0_117] : memref<3x256x256xbf16, #tpu.memory_space<vmem>>, vector<1x256x256xbf16>
    %214 = vector.shape_cast %213 : vector<1x256x256xbf16> to vector<256x256xbf16>
    %215 = arith.truncf %212 : vector<16x256xf32> to vector<16x256xbf16>
    %cst_118 = arith.constant dense<0.000000e+00> : vector<16x256xf32>
    %216 = tpu.matmul %215, %214, %cst_118 {dimension_numbers = #tpu.dot_dimension_numbers<[1], [0], [0], [1], [0, 0, 1, 1], [], []>} : vector<16x256xbf16>, vector<256x256xbf16>, vector<16x256xf32> -> vector<16x256xf32>
    %c1_119 = arith.constant 1 : index
    %c0_120 = arith.constant 0 : index
    %c0_121 = arith.constant 0 : index
    %217 = vector.load %arg14[%c1_119, %c0_120, %c0_121] : memref<3x1x256xf32, #tpu.memory_space<vmem>>, vector<1x1x256xf32>
    %218 = vector.shape_cast %217 : vector<1x1x256xf32> to vector<1x256xf32>
    %219 = vector.broadcast %218 : vector<1x256xf32> to vector<16x256xf32>
    %220 = arith.addf %216, %219 : vector<16x256xf32>
    %221 = arith.truncf %127 : vector<16x16xf32> to vector<16x16xbf16>
    %cst_122 = arith.constant dense<0.000000e+00> : vector<16x1024xf32>
    %222 = tpu.matmul %221, %162, %cst_122 {dimension_numbers = #tpu.dot_dimension_numbers<[1], [0], [0], [1], [0, 0, 1, 1], [], []>} : vector<16x16xbf16>, vector<16x1024xbf16>, vector<16x1024xf32> -> vector<16x1024xf32>
    %223 = vector.extract_strided_slice %222 {offsets = [0, 0], sizes = [16, 256], strides = [1, 1]} : vector<16x1024xf32> to vector<16x256xf32>
    %224 = arith.mulf %220, %223 : vector<16x256xf32>
    %c64_i32_123 = arith.constant 64 : i32
    %225 = tpu.dynamic_rotate %220 by %c64_i32_123 dim 1 : vector<16x256xf32>, i32 -> vector<16x256xf32>
    %226 = vector.extract_strided_slice %222 {offsets = [0, 256], sizes = [16, 256], strides = [1, 1]} : vector<16x1024xf32> to vector<16x256xf32>
    %227 = arith.mulf %225, %226 : vector<16x256xf32>
    %228 = arith.addf %224, %227 : vector<16x256xf32>
    %c128_i32_124 = arith.constant 128 : i32
    %229 = tpu.dynamic_rotate %220 by %c128_i32_124 dim 1 : vector<16x256xf32>, i32 -> vector<16x256xf32>
    %230 = vector.extract_strided_slice %222 {offsets = [0, 512], sizes = [16, 256], strides = [1, 1]} : vector<16x1024xf32> to vector<16x256xf32>
    %231 = arith.mulf %229, %230 : vector<16x256xf32>
    %232 = arith.addf %228, %231 : vector<16x256xf32>
    %c192_i32_125 = arith.constant 192 : i32
    %233 = tpu.dynamic_rotate %220 by %c192_i32_125 dim 1 : vector<16x256xf32>, i32 -> vector<16x256xf32>
    %234 = vector.extract_strided_slice %222 {offsets = [0, 768], sizes = [16, 256], strides = [1, 1]} : vector<16x1024xf32> to vector<16x256xf32>
    %235 = arith.mulf %233, %234 : vector<16x256xf32>
    %236 = arith.addf %232, %235 : vector<16x256xf32>
    %cst_126 = arith.constant 0.000000e+00 : f32
    %237 = vector.broadcast %cst_126 : f32 to vector<16x256xf32>
    %238 = arith.maximumf %236, %237 : vector<16x256xf32>
    %c2_127 = arith.constant 2 : index
    %c0_128 = arith.constant 0 : index
    %c0_129 = arith.constant 0 : index
    %239 = vector.load %arg13[%c2_127, %c0_128, %c0_129] : memref<3x256x256xbf16, #tpu.memory_space<vmem>>, vector<1x256x256xbf16>
    %240 = vector.shape_cast %239 : vector<1x256x256xbf16> to vector<256x256xbf16>
    %241 = arith.truncf %238 : vector<16x256xf32> to vector<16x256xbf16>
    %cst_130 = arith.constant dense<0.000000e+00> : vector<16x256xf32>
    %242 = tpu.matmul %241, %240, %cst_130 {dimension_numbers = #tpu.dot_dimension_numbers<[1], [0], [0], [1], [0, 0, 1, 1], [], []>} : vector<16x256xbf16>, vector<256x256xbf16>, vector<16x256xf32> -> vector<16x256xf32>
    %c2_131 = arith.constant 2 : index
    %c0_132 = arith.constant 0 : index
    %c0_133 = arith.constant 0 : index
    %243 = vector.load %arg14[%c2_131, %c0_132, %c0_133] : memref<3x1x256xf32, #tpu.memory_space<vmem>>, vector<1x1x256xf32>
    %244 = vector.shape_cast %243 : vector<1x1x256xf32> to vector<1x256xf32>
    %245 = vector.broadcast %244 : vector<1x256xf32> to vector<16x256xf32>
    %246 = arith.addf %242, %245 : vector<16x256xf32>
    %c0_134 = arith.constant 0 : index
    %c0_135 = arith.constant 0 : index
    %247 = vector.load %arg18[%c0_134, %c0_135] : memref<16x256xbf16, #tpu.memory_space<vmem>>, vector<16x256xbf16>
    %248 = arith.truncf %161 : vector<16x16xf32> to vector<16x16xbf16>
    %cst_136 = arith.constant dense<0.000000e+00> : vector<16x256xf32>
    %249 = tpu.matmul %248, %247, %cst_136 {dimension_numbers = #tpu.dot_dimension_numbers<[1], [0], [0], [1], [0, 0, 1, 1], [], []>} : vector<16x16xbf16>, vector<16x256xbf16>, vector<16x256xf32> -> vector<16x256xf32>
    %250 = arith.mulf %246, %249 : vector<16x256xf32>
    %251 = vector.extract_strided_slice %250 {offsets = [0, 0], sizes = [16, 128], strides = [1, 1]} : vector<16x256xf32> to vector<16x128xf32>
    %252 = vector.extract_strided_slice %250 {offsets = [0, 128], sizes = [16, 128], strides = [1, 1]} : vector<16x256xf32> to vector<16x128xf32>
    %253 = arith.addf %251, %252 : vector<16x128xf32>
    %c64_i32_137 = arith.constant 64 : i32
    %254 = tpu.dynamic_rotate %253 by %c64_i32_137 dim 1 : vector<16x128xf32>, i32 -> vector<16x128xf32>
    %255 = arith.addf %253, %254 : vector<16x128xf32>
    %cst_138 = arith.constant 0.000000e+00 : f32
    %256 = vector.broadcast %cst_138 : f32 to vector<16x128xf32>
    %257 = arith.maximumf %255, %256 : vector<16x128xf32>
    %c0_139 = arith.constant 0 : index
    %c0_140 = arith.constant 0 : index
    %258 = vector.load %arg15[%c0_139, %c0_140] : memref<128x128xbf16, #tpu.memory_space<vmem>>, vector<128x128xbf16>
    %259 = arith.truncf %257 : vector<16x128xf32> to vector<16x128xbf16>
    %cst_141 = arith.constant dense<0.000000e+00> : vector<16x128xf32>
    %260 = tpu.matmul %259, %258, %cst_141 {dimension_numbers = #tpu.dot_dimension_numbers<[1], [0], [0], [1], [0, 0, 1, 1], [], []>} : vector<16x128xbf16>, vector<128x128xbf16>, vector<16x128xf32> -> vector<16x128xf32>
    %c0_142 = arith.constant 0 : index
    %c0_143 = arith.constant 0 : index
    %261 = vector.load %arg16[%c0_142, %c0_143] : memref<1x128xf32, #tpu.memory_space<vmem>>, vector<1x128xf32>
    %262 = vector.broadcast %261 : vector<1x128xf32> to vector<16x128xf32>
    %263 = arith.addf %260, %262 : vector<16x128xf32>
    %c0_144 = arith.constant 0 : index
    %c0_145 = arith.constant 0 : index
    %264 = vector.load %arg20[%c0_144, %c0_145] : memref<16x128xf32, #tpu.memory_space<vmem>>, vector<16x128xf32>
    tpu.vector_store %arg20[%c0_144, %c0_145], %263 {strides = array<i32>} : memref<16x128xf32, #tpu.memory_space<vmem>>, vector<16x128xf32>,
    return
  }
  func.func @transform_0(%arg0: i32) -> (i32, i32) {
    %c0_i32 = arith.constant 0 : i32
    %c0_i32_0 = arith.constant 0 : i32
    return %arg0, %c0_i32 : i32, i32
  }
  func.func @transform_1(%arg0: i32) -> (i32, i32) {
    %c0_i32 = arith.constant 0 : i32
    %c0_i32_0 = arith.constant 0 : i32
    return %arg0, %c0_i32 : i32, i32
  }
  func.func @transform_2(%arg0: i32) -> (i32, i32) {
    %c0_i32 = arith.constant 0 : i32
    %c0_i32_0 = arith.constant 0 : i32
    %c0_i32_1 = arith.constant 0 : i32
    return %c0_i32, %c0_i32_0 : i32, i32
  }
  func.func @transform_3(%arg0: i32) -> (i32, i32) {
    %c0_i32 = arith.constant 0 : i32
    %c0_i32_0 = arith.constant 0 : i32
    %c0_i32_1 = arith.constant 0 : i32
    return %c0_i32, %c0_i32_0 : i32, i32
  }
  func.func @transform_4(%arg0: i32) -> (i32, i32) {
    %c0_i32 = arith.constant 0 : i32
    %c0_i32_0 = arith.constant 0 : i32
    %c0_i32_1 = arith.constant 0 : i32
    return %c0_i32, %c0_i32_0 : i32, i32
  }
  func.func @transform_5(%arg0: i32) -> (i32, i32, i32) {
    %c0_i32 = arith.constant 0 : i32
    %c0_i32_0 = arith.constant 0 : i32
    %c0_i32_1 = arith.constant 0 : i32
    %c0_i32_2 = arith.constant 0 : i32
    return %c0_i32, %c0_i32_0, %c0_i32_1 : i32, i32, i32
  }
  func.func @transform_6(%arg0: i32) -> (i32, i32, i32) {
    %c0_i32 = arith.constant 0 : i32
    %c0_i32_0 = arith.constant 0 : i32
    %c0_i32_1 = arith.constant 0 : i32
    %c0_i32_2 = arith.constant 0 : i32
    return %c0_i32, %c0_i32_0, %c0_i32_1 : i32, i32, i32
  }
  func.func @transform_7(%arg0: i32) -> (i32, i32, i32) {
    %c0_i32 = arith.constant 0 : i32
    %c0_i32_0 = arith.constant 0 : i32
    %c0_i32_1 = arith.constant 0 : i32
    %c0_i32_2 = arith.constant 0 : i32
    return %c0_i32, %c0_i32_0, %c0_i32_1 : i32, i32, i32
  }
  func.func @transform_8(%arg0: i32) -> (i32, i32, i32) {
    %c0_i32 = arith.constant 0 : i32
    %c0_i32_0 = arith.constant 0 : i32
    %c0_i32_1 = arith.constant 0 : i32
    %c0_i32_2 = arith.constant 0 : i32
    return %c0_i32, %c0_i32_0, %c0_i32_1 : i32, i32, i32
  }
  func.func @transform_9(%arg0: i32) -> (i32, i32, i32) {
    %c0_i32 = arith.constant 0 : i32
    %c0_i32_0 = arith.constant 0 : i32
    %c0_i32_1 = arith.constant 0 : i32
    %c0_i32_2 = arith.constant 0 : i32
    return %c0_i32, %c0_i32_0, %c0_i32_1 : i32, i32, i32
  }
  func.func @transform_10(%arg0: i32) -> (i32, i32) {
    %c0_i32 = arith.constant 0 : i32
    %c0_i32_0 = arith.constant 0 : i32
    %c0_i32_1 = arith.constant 0 : i32
    return %c0_i32, %c0_i32_0 : i32, i32
  }
  func.func @transform_11(%arg0: i32) -> (i32, i32) {
    %c0_i32 = arith.constant 0 : i32
    %c0_i32_0 = arith.constant 0 : i32
    %c0_i32_1 = arith.constant 0 : i32
    return %c0_i32, %c0_i32_0 : i32, i32
  }
  func.func @transform_12(%arg0: i32) -> (i32, i32, i32) {
    %c0_i32 = arith.constant 0 : i32
    %c0_i32_0 = arith.constant 0 : i32
    %c0_i32_1 = arith.constant 0 : i32
    %c0_i32_2 = arith.constant 0 : i32
    return %c0_i32, %c0_i32_0, %c0_i32_1 : i32, i32, i32
  }
  func.func @transform_13(%arg0: i32) -> (i32, i32, i32) {
    %c0_i32 = arith.constant 0 : i32
    %c0_i32_0 = arith.constant 0 : i32
    %c0_i32_1 = arith.constant 0 : i32
    %c0_i32_2 = arith.constant 0 : i32
    return %c0_i32, %c0_i32_0, %c0_i32_1 : i32, i32, i32
  }
  func.func @transform_14(%arg0: i32) -> (i32, i32) {
    %c0_i32 = arith.constant 0 : i32
    %c0_i32_0 = arith.constant 0 : i32
    %c0_i32_1 = arith.constant 0 : i32
    return %c0_i32, %c0_i32_0 : i32, i32
  }
  func.func @transform_15(%arg0: i32) -> (i32, i32) {
    %c0_i32 = arith.constant 0 : i32
    %c0_i32_0 = arith.constant 0 : i32
    %c0_i32_1 = arith.constant 0 : i32
    return %c0_i32, %c0_i32_0 : i32, i32
  }
  func.func @transform_16(%arg0: i32) -> (i32, i32) {
    %c0_i32 = arith.constant 0 : i32
    %c0_i32_0 = arith.constant 0 : i32
    %c0_i32_1 = arith.constant 0 : i32
    return %c0_i32, %c0_i32_0 : i32, i32
  }
  func.func @transform_17(%arg0: i32) -> (i32, i32) {
    %c0_i32 = arith.constant 0 : i32
    %c0_i32_0 = arith.constant 0 : i32
    %c0_i32_1 = arith.constant 0 : i32
    return %c0_i32, %c0_i32_0 : i32, i32
  }
  func.func @transform_18(%arg0: i32) -> (i32, i32) {
    %c0_i32 = arith.constant 0 : i32
    %c0_i32_0 = arith.constant 0 : i32
    %c0_i32_1 = arith.constant 0 : i32
    return %c0_i32, %c0_i32_0 : i32, i32
  }
  func.func @transform_19(%arg0: i32) -> (i32, i32) {
    %c0_i32 = arith.constant 0 : i32
    %c0_i32_0 = arith.constant 0 : i32
    return %arg0, %c0_i32 : i32, i32
  }
}

</mosaic_0001>

<bundles_post_ra>
// kernel: tpu_custom_call.1
= control target key start
LH: loop header
LB: loop body
LE: loop exit
PB: predicated region body
PF: predicated region fallthrough
CT: control target
= control target key end

     0   :  { %s5087_s0 = inlined_call_operand.hbm [shape: f32[16,32], index: 0, kind: input, shape index: {}]   ;;  %s5088_s1 = inlined_call_operand.hbm [shape: f32[16,16], index: 1, kind: input, shape index: {}]   ;;  %s5089_s2 = inlined_call_operand.hbm [shape: bf16[32,64], index: 2, kind: input, shape index: {}]   ;;  %s5090_s3 = inlined_call_operand.hbm [shape: bf16[64,64], index: 3, kind: input, shape index: {}]   ;;  %s5091_s4 = inlined_call_operand.hbm [shape: bf16[16,64], index: 4, kind: input, shape index: {}]   ;;  %s5092_s5 = inlined_call_operand.vmem [shape: bf16[2,64,64], index: 5, kind: input, shape index: {}]   ;;  %s5093_s6 = inlined_call_operand.vmem [shape: bf16[4,64,16], index: 6, kind: input, shape index: {}]   ;;  %s5094_s7 = inlined_call_operand.hbm [shape: f32[4,1,16], index: 7, kind: input, shape index: {}]   ;;  %s5095_s8 = inlined_call_operand.hbm [shape: bf16[3,16,192], index: 8, kind: input, shape index: {}]   ;;  %s5096_s9 = inlined_call_operand.hbm [shape: f32[8,1,64], index: 9, kind: input, shape index: {}]   ;;  %s5097_s10 = inlined_call_operand.vmem [shape: bf16[64,256], index: 10, kind: input, shape index: {}]   ;;  %s5098_s11 = inlined_call_operand.hbm [shape: f32[1,256], index: 11, kind: input, shape index: {}]   ;;  %s5099_s12 = inlined_call_operand.hbm [shape: bf16[3,256,256], index: 12, kind: input, shape index: {}]   ;;  %s5100_s13 = inlined_call_operand.hbm [shape: f32[3,1,256], index: 13, kind: input, shape index: {}]   ;;  %s5101_s14 = inlined_call_operand.vmem [shape: bf16[128,128], index: 14, kind: input, shape index: {}]   ;;  %s5102_s15 = inlined_call_operand.hbm [shape: f32[1,128], index: 15, kind: input, shape index: {}]   ;;  %s5103_s16 = inlined_call_operand.hbm [shape: bf16[16,1024], index: 16, kind: input, shape index: {}]   ;;  %s5104_s17 = inlined_call_operand.vmem [shape: bf16[16,256], index: 17, kind: input, shape index: {}]   ;;  %s5105_s18 = inlined_call_operand.vmem [shape: bf16[16,16], index: 18, kind: input, shape index: {}]   ;;  %s5106_s19 = inlined_call_operand.hbm [shape: f32[16,128], index: 19, kind: output, shape index: {}]  }
   0x1   :  { %5118 = sst [smem:[#allocation32_spill]] %s5087_s0 }
   0x2   :  { %5119 = sst [smem:[#allocation33_spill]] %s5088_s1 }
   0x3   :  { %5120 = sst [smem:[#allocation34_spill]] %s5089_s2 }
   0x4   :  { %5121 = sst [smem:[#allocation35_spill]] %s5090_s3 }
   0x5   :  { %5122 = sst [smem:[#allocation36_spill]] %s5101_s14 }
   0x6   :  { %5123 = sst [smem:[#allocation37_spill]] %s5104_s17 }
   0x7   :  { %5124 = sst [smem:[#allocation38_spill]] %s5106_s19 }
   0x8   :  { %24 = vsyncpa [#allocation3], 0 }
   0x9   :  { %25 = vsyncpa [#allocation6], 0 }
   0xa   :  { %26 = vsyncpa [#allocation9], 0 }
   0xb   :  { %27 = vsyncpa [#allocation12], 0 }
   0xc   :  { %28 = vsyncpa [#allocation15], 0 }
   0xd   :  { %29 = vsyncpa [#allocation18], 0 }
   0xe   :  { %30 = vsyncpa [#allocation21], 0 }
   0xf   :  { %31 = vsyncpa [#allocation4], 0  ;;  %s4217_s0 = smov [#allocation5]   ;;  %s5125_s1 = sld [smem:[#allocation33_spill]] }
  0x10   :  { %s49_s30 = sshll.u32 %s4217_s0, 4  ;;  %s50_s30 = int_to_ptr.vmem [resolvable:$true] %s49_s30 }
  0x15   :  { %s3893_s22 = scalar_lea.hbm %s5125_s1, 256 }
  0x16   :  { %p3894_p0 = scmp.ne.s32.totalorder %s5125_s1, %s3893_s22  ;;  %p3897_p1 = scmp.lt.u32.totalorder %s3893_s22, %s5125_s1 }
  0x18   :  { %p3899_p2 = pnand %p3897_p1, %p3894_p0 }
  0x1a   :  { %3902 = shalt.err (!%p3899_p2)
}
  0x1b   :  { %s3903_s3 = scalar_lea.vmem %s50_s30, 256  ;;  %p3908_p4 = scmp.lt.s32.totalorder %s50_s30, %s50_s30 }
  0x1c   :  { %p3904_p3 = scmp.ne.s32.totalorder %s50_s30, %s3903_s3  ;;  %p3909_p5 = scmp.lt.s32.totalorder %s3903_s3, %s3903_s3 }
  0x1e   :  { %p3910_p6 = por %p3909_p5, %p3908_p4 }
  0x20   :  { %p3911_p7 = pnand %p3910_p6, %p3904_p3 }
  0x22   :  { %3914 = shalt.err (!%p3911_p7)
}
  0x23   :  { %s4218_s26 = smov 128   ;;  %s4219_s27 = smov 8  }
  0x24   :  { %55 = dma.hbm_to_vmem [thread:$0]  %s5125_s1, 256, %s50_s30, [#allocation6], %s4218_s26, %s4218_s26, %s4219_s27  }
  0x25   :  { %s4220_s0 = smov [#allocation8]   ;;  %s4221_s21 = smov [#allocation11]  }
  0x26   :  { %s73_s20 = sshll.u32 %s4220_s0, 4  ;;  %s101_s22 = sshll.u32 %s4221_s21, 4  ;;  %s74_s20 = int_to_ptr.vmem [resolvable:$true] %s73_s20  ;;  %s102_s22 = int_to_ptr.vmem [resolvable:$true] %s101_s22 }
  0x27   :  { %s5126_s24 = sld [smem:[#allocation35_spill]] }
  0x2d   :  { %s3915_s25 = scalar_lea.hbm %s5126_s24, 512 }
  0x2e   :  { %p3916_p8 = scmp.ne.s32.totalorder %s5126_s24, %s3915_s25  ;;  %p3919_p9 = scmp.lt.u32.totalorder %s3915_s25, %s5126_s24 }
  0x30   :  { %p3921_p10 = pnand %p3919_p9, %p3916_p8 }
  0x32   :  { %3924 = shalt.err (!%p3921_p10)
}
  0x33   :  { %s3925_s30 = scalar_lea.vmem %s74_s20, 512  ;;  %p3930_p12 = scmp.lt.s32.totalorder %s74_s20, %s74_s20 }
  0x34   :  { %p3926_p11 = scmp.ne.s32.totalorder %s74_s20, %s3925_s30  ;;  %p3931_p13 = scmp.lt.s32.totalorder %s3925_s30, %s3925_s30 }
  0x36   :  { %p3932_p0 = por %p3931_p13, %p3930_p12 }
  0x38   :  { %p3933_p1 = pnand %p3932_p0, %p3926_p11 }
  0x3a   :  { %3936 = shalt.err (!%p3933_p1)
}
  0x3b   :  { %s5114_s1 = smov 64   ;;  %s5116_s28 = smov 4  }
  0x3c   :  { %79 = dma.hbm_to_vmem [thread:$0]  %s5126_s24, 512, %s74_s20, [#allocation9], %s5114_s1, %s5114_s1, %s5116_s28  }
  0x3d   :  { %s3937_s0 = scalar_lea.hbm %s5094_s7, 64 }
  0x3e   :  { %p3938_p2 = scmp.ne.s32.totalorder %s5094_s7, %s3937_s0  ;;  %p3941_p3 = scmp.lt.u32.totalorder %s3937_s0, %s5094_s7 }
  0x40   :  { %p3943_p4 = pnand %p3941_p3, %p3938_p2 }
  0x42   :  { %3946 = shalt.err (!%p3943_p4)
}
  0x43   :  { %s3947_s3 = scalar_lea.vmem %s102_s22, 64  ;;  %p3952_p6 = scmp.lt.s32.totalorder %s102_s22, %s102_s22 }
  0x44   :  { %p3948_p5 = scmp.ne.s32.totalorder %s102_s22, %s3947_s3  ;;  %p3953_p7 = scmp.lt.s32.totalorder %s3947_s3, %s3947_s3 }
  0x46   :  { %p3954_p8 = por %p3953_p7, %p3952_p6 }
  0x48   :  { %p3955_p9 = pnand %p3954_p8, %p3948_p5 }
  0x4a   :  { %3958 = shalt.err (!%p3955_p9)
}
  0x4b   :  { %s4224_s20 = smov 16   ;;  %s4225_s24 = smov 1  }
  0x4c   :  { %107 = dma.hbm_to_vmem [thread:$0]  %s5094_s7, 64, %s102_s22, [#allocation12], %s4224_s20, %s4224_s20, %s4225_s24  }
  0x4d   :  { %s4226_s29 = smov [#allocation14]   ;;  %s4227_s17 = smov [#allocation17]  }
  0x4e   :  { %s125_s14 = sshll.u32 %s4226_s29, 4  ;;  %s149_s0 = sshll.u32 %s4227_s17, 4  ;;  %s126_s14 = int_to_ptr.vmem [resolvable:$true] %s125_s14  ;;  %s150_s0 = int_to_ptr.vmem [resolvable:$true] %s149_s0 }
  0x4f   :  { %s3959_s23 = scalar_lea.hbm %s5096_s9, 128 }
  0x50   :  { %p3960_p10 = scmp.ne.s32.totalorder %s5096_s9, %s3959_s23  ;;  %p3963_p11 = scmp.lt.u32.totalorder %s3959_s23, %s5096_s9 }
  0x52   :  { %p3965_p12 = pnand %p3963_p11, %p3960_p10 }
  0x54   :  { %3968 = shalt.err (!%p3965_p12)
}
  0x55   :  { %s3969_s7 = scalar_lea.vmem %s126_s14, 128  ;;  %p3974_p0 = scmp.lt.s32.totalorder %s126_s14, %s126_s14 }
  0x56   :  { %p3970_p13 = scmp.ne.s32.totalorder %s126_s14, %s3969_s7  ;;  %p3975_p1 = scmp.lt.s32.totalorder %s3969_s7, %s3969_s7 }
  0x58   :  { %p3976_p2 = por %p3975_p1, %p3974_p0 }
  0x5a   :  { %p3977_p3 = pnand %p3976_p2, %p3970_p13 }
  0x5c   :  { %3980 = shalt.err (!%p3977_p3)
}
  0x5d   :  { %131 = dma.hbm_to_vmem [thread:$0]  %s5096_s9, 128, %s126_s14, [#allocation15], %s4224_s20, %s4224_s20, %s4225_s24  }
  0x5e   :  { %s3981_s17 = scalar_lea.hbm %s5099_s12, 12288 }
  0x5f   :  { %p3982_p4 = scmp.ne.s32.totalorder %s5099_s12, %s3981_s17  ;;  %p3985_p5 = scmp.lt.u32.totalorder %s3981_s17, %s5099_s12 }
  0x61   :  { %p3987_p6 = pnand %p3985_p5, %p3982_p4 }
  0x63   :  { %3990 = shalt.err (!%p3987_p6)
}
  0x64   :  { %s3991_s23 = scalar_lea.vmem %s150_s0, 12288  ;;  %p3996_p8 = scmp.lt.s32.totalorder %s150_s0, %s150_s0 }
  0x65   :  { %p3992_p7 = scmp.ne.s32.totalorder %s150_s0, %s3991_s23  ;;  %p3997_p9 = scmp.lt.s32.totalorder %s3991_s23, %s3991_s23 }
  0x67   :  { %p3998_p10 = por %p3997_p9, %p3996_p8 }
  0x69   :  { %p3999_p11 = pnand %p3998_p10, %p3992_p7 }
  0x6b   :  { %4002 = shalt.err (!%p3999_p11)
}
  0x6c   :  { %155 = dma.hbm_to_vmem [thread:$0]  %s5099_s12, 12288, %s150_s0, [#allocation18], %s4218_s26, %s4218_s26, %s4219_s27  }
  0x6d   :  { %s4228_s24 = smov [#allocation20]   ;;  %s4229_s25 = smov [#allocation2]  }
  0x6e   :  { %s176_s14 = sshll.u32 %s4228_s24, 4  ;;  %s37_s3 = sshll.u32 %s4229_s25, 4  ;;  %s177_s14 = int_to_ptr.vmem [resolvable:$true] %s176_s14  ;;  %s38_s3 = int_to_ptr.vmem [resolvable:$true] %s37_s3 }
  0x6f   :  { %s4003_s30 = scalar_lea.hbm %s5102_s15, 16 }
  0x70   :  { %p4004_p12 = scmp.ne.s32.totalorder %s5102_s15, %s4003_s30  ;;  %p4007_p13 = scmp.lt.u32.totalorder %s4003_s30, %s5102_s15 }
  0x72   :  { %p4009_p0 = pnand %p4007_p13, %p4004_p12 }
  0x74   :  { %4012 = shalt.err (!%p4009_p0)
}
  0x75   :  { %s4013_s12 = scalar_lea.vmem %s177_s14, 16  ;;  %s4017_s0 = scalar_lea.vmem %s177_s14, 32 }
  0x76   :  { %p4014_p1 = scmp.ne.s32.totalorder %s177_s14, %s4013_s12  ;;  %p4018_p2 = scmp.lt.s32.totalorder %s177_s14, %s177_s14 }
  0x77   :  { %p4019_p3 = scmp.lt.s32.totalorder %s4017_s0, %s4013_s12 }
  0x79   :  { %p4020_p4 = por %p4019_p3, %p4018_p2 }
  0x7b   :  { %p4021_p5 = pnand %p4020_p4, %p4014_p1 }
  0x7d   :  { %4024 = shalt.err (!%p4021_p5)
}
  0x7e   :  { %179 = dma.hbm_to_vmem [thread:$0]  %s5102_s15, 16, %s177_s14, [#allocation21]  }
  0x7f   :  { %s5127_s9 = sld [smem:[#allocation32_spill]] }
  0x85   :  { %s4025_s20 = scalar_lea.hbm %s5127_s9, 256 }
  0x86   :  { %p4026_p6 = scmp.ne.s32.totalorder %s5127_s9, %s4025_s20  ;;  %p4029_p7 = scmp.lt.u32.totalorder %s4025_s20, %s5127_s9 }
  0x88   :  { %p4031_p8 = pnand %p4029_p7, %p4026_p6 }
  0x8a   :  { %4034 = shalt.err (!%p4031_p8)
}
  0x8b   :  { %s4035_s30 = scalar_lea.vmem %s38_s3, 256  ;;  %p4040_p10 = scmp.lt.s32.totalorder %s38_s3, %s38_s3 }
  0x8c   :  { %p4036_p9 = scmp.ne.s32.totalorder %s38_s3, %s4035_s30  ;;  %p4041_p11 = scmp.lt.s32.totalorder %s4035_s30, %s4035_s30 }
  0x8e   :  { %p4042_p12 = por %p4041_p11, %p4040_p10 }
  0x90   :  { %p4043_p13 = pnand %p4042_p12, %p4036_p9 }
  0x92   :  { %4046 = shalt.err (!%p4043_p13)
}
  0x93   :  { %43 = dma.hbm_to_vmem [thread:$0]  %s5127_s9, 256, %s38_s3, [#allocation3], %s4218_s26, %s4218_s26, %s4219_s27  }
  0x94   :  { %s4230_s19 = smov [#allocation7]   ;;  %s4231_s17 = smov [#allocation10]  }
  0x95   :  { %s61_s29 = sshll.u32 %s4230_s19, 4  ;;  %s85_s1 = sshll.u32 %s4231_s17, 4  ;;  %s62_s29 = int_to_ptr.vmem [resolvable:$true] %s61_s29  ;;  %s86_s1 = int_to_ptr.vmem [resolvable:$true] %s85_s1 }
  0x96   :  { %s5128_s28 = sld [smem:[#allocation34_spill]] }
  0x9c   :  { %s4047_s21 = scalar_lea.hbm %s5128_s28, 256 }
  0x9d   :  { %p4048_p0 = scmp.ne.s32.totalorder %s5128_s28, %s4047_s21  ;;  %p4051_p1 = scmp.lt.u32.totalorder %s4047_s21, %s5128_s28 }
  0x9f   :  { %p4053_p2 = pnand %p4051_p1, %p4048_p0 }
  0xa1   :  { %4056 = shalt.err (!%p4053_p2)
}
  0xa2   :  { %s4057_s3 = scalar_lea.vmem %s62_s29, 256  ;;  %p4062_p4 = scmp.lt.s32.totalorder %s62_s29, %s62_s29 }
  0xa3   :  { %p4058_p3 = scmp.ne.s32.totalorder %s62_s29, %s4057_s3  ;;  %p4063_p5 = scmp.lt.s32.totalorder %s4057_s3, %s4057_s3 }
  0xa5   :  { %p4064_p6 = por %p4063_p5, %p4062_p4 }
  0xa7   :  { %p4065_p7 = pnand %p4064_p6, %p4058_p3 }
  0xa9   :  { %4068 = shalt.err (!%p4065_p7)
}
  0xaa   :  { %s5129_s9 = smov 4   ;;  %s5130_s25 = smov 64  }
  0xab   :  { %67 = dma.hbm_to_vmem [thread:$0]  %s5128_s28, 256, %s62_s29, [#allocation6], %s5130_s25, %s5130_s25, %s5129_s9  }
  0xac   :  { %s4069_s14 = scalar_lea.hbm %s5091_s4, 128 }
  0xad   :  { %p4070_p8 = scmp.ne.s32.totalorder %s5091_s4, %s4069_s14  ;;  %p4073_p9 = scmp.lt.u32.totalorder %s4069_s14, %s5091_s4 }
  0xaf   :  { %p4075_p10 = pnand %p4073_p9, %p4070_p8 }
  0xb1   :  { %4078 = shalt.err (!%p4075_p10)
}
  0xb2   :  { %s4079_s21 = scalar_lea.vmem %s86_s1, 128  ;;  %p4084_p12 = scmp.lt.s32.totalorder %s86_s1, %s86_s1 }
  0xb3   :  { %p4080_p11 = scmp.ne.s32.totalorder %s86_s1, %s4079_s21  ;;  %p4085_p13 = scmp.lt.s32.totalorder %s4079_s21, %s4079_s21 }
  0xb5   :  { %p4086_p0 = por %p4085_p13, %p4084_p12 }
  0xb7   :  { %p4087_p1 = pnand %p4086_p0, %p4080_p11 }
  0xb9   :  { %4090 = shalt.err (!%p4087_p1)
}
  0xba   :  { %91 = dma.hbm_to_vmem [thread:$0]  %s5091_s4, 128, %s86_s1, [#allocation9], %s5130_s25, %s5130_s25, %s5129_s9  }
  0xbb   :  { %s4232_s2 = smov [#allocation13]   ;;  %s4233_s20 = smov [#allocation16]  }
  0xbc   :  { %s113_s23 = sshll.u32 %s4232_s2, 4  ;;  %s140_s24 = sshll.u32 %s4233_s20, 4  ;;  %s114_s23 = int_to_ptr.vmem [resolvable:$true] %s113_s23  ;;  %s141_s24 = int_to_ptr.vmem [resolvable:$true] %s140_s24 }
  0xbd   :  { %s4091_s22 = scalar_lea.hbm %s5095_s8, 768 }
  0xbe   :  { %p4092_p2 = scmp.ne.s32.totalorder %s5095_s8, %s4091_s22  ;;  %p4095_p3 = scmp.lt.u32.totalorder %s4091_s22, %s5095_s8 }
  0xc0   :  { %p4097_p4 = pnand %p4095_p3, %p4092_p2 }
  0xc2   :  { %4100 = shalt.err (!%p4097_p4)
}
  0xc3   :  { %s4101_s4 = scalar_lea.vmem %s114_s23, 768  ;;  %p4106_p6 = scmp.lt.s32.totalorder %s114_s23, %s114_s23 }
  0xc4   :  { %p4102_p5 = scmp.ne.s32.totalorder %s114_s23, %s4101_s4  ;;  %p4107_p7 = scmp.lt.s32.totalorder %s4101_s4, %s4101_s4 }
  0xc6   :  { %p4108_p8 = por %p4107_p7, %p4106_p6 }
  0xc8   :  { %p4109_p9 = pnand %p4108_p8, %p4102_p5 }
  0xca   :  { %4112 = shalt.err (!%p4109_p9)
}
  0xcb   :  { %119 = dma.hbm_to_vmem [thread:$0]  %s5095_s8, 768, %s114_s23, [#allocation12], %s4218_s26, %s4218_s26, %s4219_s27  }
  0xcc   :  { %s4113_s0 = scalar_lea.hbm %s5098_s11, 32 }
  0xcd   :  { %p4114_p10 = scmp.ne.s32.totalorder %s5098_s11, %s4113_s0  ;;  %p4117_p11 = scmp.lt.u32.totalorder %s4113_s0, %s5098_s11 }
  0xcf   :  { %p4119_p12 = pnand %p4117_p11, %p4114_p10 }
  0xd1   :  { %4122 = shalt.err (!%p4119_p12)
}
  0xd2   :  { %s4123_s20 = scalar_lea.vmem %s141_s24, 32  ;;  %p4128_p0 = scmp.lt.s32.totalorder %s141_s24, %s141_s24 }
  0xd3   :  { %p4124_p13 = scmp.ne.s32.totalorder %s141_s24, %s4123_s20  ;;  %p4129_p1 = scmp.lt.s32.totalorder %s4123_s20, %s4123_s20 }
  0xd5   :  { %p4130_p2 = por %p4129_p1, %p4128_p0 }
  0xd7   :  { %p4131_p3 = pnand %p4130_p2, %p4124_p13 }
  0xd9   :  { %4134 = shalt.err (!%p4131_p3)
}
  0xda   :  { %143 = dma.hbm_to_vmem [thread:$0]  %s5098_s11, 32, %s141_s24, [#allocation15]  }
  0xdb   :  { %s4234_s3 = smov [#allocation19]   ;;  %s4135_s15 = scalar_lea.hbm %s5100_s13, 96 }
  0xdc   :  { %s161_s7 = sshll.u32 %s4234_s3, 4  ;;  %p4136_p4 = scmp.ne.s32.totalorder %s5100_s13, %s4135_s15  ;;  %s162_s7 = int_to_ptr.vmem [resolvable:$true] %s161_s7 }
  0xdd   :  { %p4139_p5 = scmp.lt.u32.totalorder %s4135_s15, %s5100_s13 }
  0xdf   :  { %p4141_p6 = pnand %p4139_p5, %p4136_p4 }
  0xe1   :  { %4144 = shalt.err (!%p4141_p6)
}
  0xe2   :  { %s4145_s9 = scalar_lea.vmem %s162_s7, 96  ;;  %p4150_p8 = scmp.lt.s32.totalorder %s162_s7, %s162_s7 }
  0xe3   :  { %p4146_p7 = scmp.ne.s32.totalorder %s162_s7, %s4145_s9  ;;  %p4151_p9 = scmp.lt.s32.totalorder %s4145_s9, %s4145_s9 }
  0xe5   :  { %p4152_p10 = por %p4151_p9, %p4150_p8 }
  0xe7   :  { %p4153_p11 = pnand %p4152_p10, %p4146_p7 }
  0xe9   :  { %4156 = shalt.err (!%p4153_p11)
}
  0xea   :  { %s4235_s11 = smov 32   ;;  %s4236_s24 = smov 2  }
  0xeb   :  { %167 = dma.hbm_to_vmem [thread:$0]  %s5100_s13, 96, %s162_s7, [#allocation18], %s4235_s11, %s4235_s11, %s4236_s24  }
  0xec   :  { %s4237_s0 = smov [#allocation22]   ;;  %s4157_s2 = scalar_lea.hbm %s5103_s16, 1024 }
  0xed   :  { %s185_s21 = sshll.u32 %s4237_s0, 4  ;;  %p4158_p12 = scmp.ne.s32.totalorder %s5103_s16, %s4157_s2  ;;  %s186_s21 = int_to_ptr.vmem [resolvable:$true] %s185_s21 }
  0xee   :  { %p4161_p13 = scmp.lt.u32.totalorder %s4157_s2, %s5103_s16 }
  0xf0   :  { %p4163_p0 = pnand %p4161_p13, %p4158_p12 }
  0xf2   :  { %4166 = shalt.err (!%p4163_p0)
}
  0xf3   :  { %s4167_s22 = scalar_lea.vmem %s186_s21, 1024  ;;  %p4172_p2 = scmp.lt.s32.totalorder %s186_s21, %s186_s21 }
  0xf4   :  { %p4168_p1 = scmp.ne.s32.totalorder %s186_s21, %s4167_s22  ;;  %p4173_p3 = scmp.lt.s32.totalorder %s4167_s22, %s4167_s22 }
  0xf6   :  { %p4174_p4 = por %p4173_p3, %p4172_p2 }
  0xf8   :  { %p4175_p5 = pnand %p4174_p4, %p4168_p1 }
  0xfa   :  { %4178 = shalt.err (!%p4175_p5)
}
  0xfb   :  { %s4238_s13 = smov 512  }
  0xfc   :  { %191 = dma.hbm_to_vmem [thread:$0]  %s5103_s16, 1024, %s186_s21, [#allocation21], %s4238_s13, %s4238_s13, %s4235_s11  }
  0xfd   :  { %4201 = dma.done.wait [#allocation3], 256  }
  0xfe   :  { %4202 = vsyncadd [#allocation3], 4294967040 }
  0xff   :  { %4203 = dma.done.wait [#allocation6], 512  }
 0x100   :  { %4204 = vsyncadd [#allocation6], 4294966784 }
 0x101   :  { %4205 = dma.done.wait [#allocation9], 640  }
 0x102   :  { %4206 = vsyncadd [#allocation9], 4294966656 }
 0x103   :  { %4207 = dma.done.wait [#allocation12], 832  }
 0x104   :  { %4208 = vsyncadd [#allocation12], 4294966464 }
 0x105   :  { %4209 = dma.done.wait [#allocation15], 160  }
 0x106   :  { %4210 = vsyncadd [#allocation15], 4294967136 }
 0x107   :  { %4211 = dma.done.wait [#allocation18], 12384  }
 0x108   :  { %4212 = vsyncadd [#allocation18], 4294954912 }
 0x109   :  { %4213 = dma.done.wait [#allocation21], 1040  }
 0x10a   :  { %4214 = vsyncadd [#allocation21], 4294966256  ;;  %v4239_v0 = vmov 0.0   ;;  %vm4240_vm0 = vmmov 0   ;;  %v3653_v1 = vld [vmem:[#allocation7] sm:$0xff]   ;;  %v3654_v2 = vld [vmem:[#allocation7 + $0x8] sm:$0xff]  }
 0x10b   :  { %3491 = vmatprep.subr.bf16.mxu1 %v4239_v0  ;;  %3495 = vmatprep.mubr.msk.bf16.mxu1 %vm4240_vm0, %v4239_v0  ;;  %v236_v3 = vld [vmem:[#allocation2] sm:$0xff]  ;;  %v237_v4 = vld [vmem:[#allocation2 + $0x8] sm:$0xff]  ;;  %vm264_vm1 = vcmask 261120   ;;  %v3655_v5 = vld [vmem:[#allocation8] sm:$0xff]   ;;  %vm414_vm2 = vcmask 130048   ;;  %vm352_vm3 = vcmask 523264  }
 0x10c   :  { %3511 = vmatprep.subr.bf16.mxu0 %v4239_v0  ;;  %3513 = vmatprep.mubr.msk.bf16.mxu0 %vm4240_vm0, %v4239_v0  ;;  %v244_v6 = vpack.c.bf16 %v237_v4, %v236_v3  ;;  %v3656_v7 = vld [vmem:[#allocation8 + $0x8] sm:$0xff]   ;;  %v3657_v8 = vld [vmem:[#allocation8 + $0x10] sm:$0xff]   ;;  %v3658_v9 = vld [vmem:[#allocation10] sm:$0xff]   ;;  %s5131_s28 = sld [smem:[#allocation37_spill]]  ;;  %s5132_s3 = sld [smem:[#allocation36_spill]] }
 0x10d   :  { %3492 = vmatpush3.bf16.msra.mxu1 %v3653_v1  ;;  %3512 = vmatpush3.bf16.msra.mxu0 %v3658_v9  ;;  %v238_v10 = vld [vmem:[#allocation5] sm:$0xff]  ;;  %v239_v11 = vld [vmem:[#allocation5 + $0x8] sm:$0xff]  ;;  %v3659_v12 = vld [vmem:[#allocation8 + $0x18] sm:$0xff]   ;;  %s4242_s24 = smov [#allocation23]  }
 0x10e   :  { %3493 = vmatprep.subr.bf16.mxu1 %v4239_v0  ;;  %v399_v13 = vpack.c.bf16 %v239_v11, %v238_v10  ;;  %3517 = vmatprep.subr.bf16.mxu0 %v4239_v0  ;;  %v3660_v14 = vld [vmem:[%s5092_s5] sm:$0xff]   ;;  %v3202_v15 = vld [vmem:[#allocation14] ss:$0 sm:$0xff]  ;;  %v3662_v30 = vld [vmem:[%s5092_s5 + $0x10] sm:$0xff]   ;;  %s3184_s17 = sshll.u32 %s4242_s24, 4  ;;  %s3185_s17 = int_to_ptr.vmem [resolvable:$true] %s3184_s17 }
 0x10f   :  { %v3661_v27 = vld [vmem:[%s5092_s5 + $0x8] sm:$0xff]   ;;  %v3663_v31 = vld [vmem:[%s5092_s5 + $0x18] sm:$0xff]   ;;  %v3664_v32 = vld [vmem:[%s5092_s5 + $0x20] sm:$0xff]   ;;  %p4184_p7 = scmp.lt.s32.totalorder %s3185_s17, %s3185_s17 }
 0x110   :  { %3514 = vmatmul.mubr.msk.bf16.vlgmr.msra.gmra.mrb[0].mxu0 %vm414_vm2, %v399_v13  ;;  %v3665_v33 = vld [vmem:[%s5092_s5 + $0x28] sm:$0xff]   ;;  %v3666_v52 = vld [vmem:[%s5092_s5 + $0x30] sm:$0xff]   ;;  %v3667_v53 = vld [vmem:[%s5092_s5 + $0x38] sm:$0xff]  }
 0x111   :  { %3494 = vmatpush3.bf16.msra.mxu1 %v3654_v2  ;;  %3525 = vmatprep.mubr.msk.bf16.mxu0 %vm4240_vm0, %v4239_v0  ;;  %v3212_v34 = vld [vmem:[#allocation14 + $0x2] ss:$0 sm:$0xff]  ;;  %v3206_v35 = vld [vmem:[#allocation14 + $0x1] ss:$0 sm:$0xff]  ;;  %v3668_v54 = vld [vmem:[%s5093_s6] sm:$0xff]  }
 0x112   :  { %3499 = vmatprep.subr.bf16.mxu1 %v4239_v0  ;;  %3518 = vmatpush3.bf16.msra.mxu0 %v3660_v14  ;;  %v3669_v55 = vld [vmem:[%s5093_s6 + $0x8] sm:$0xff]   ;;  %v3670_v3 = vld [vmem:[%s5093_s6 + $0x10] sm:$0xff]   ;;  %v3671_v4 = vld [vmem:[%s5093_s6 + $0x18] sm:$0xff]  }
 0x113   :  { %3519 = vmatprep.subr.bf16.mxu0 %v4239_v0  ;;  %v3215_v56 = vld [vmem:[#allocation14 + $0x3] ss:$0 sm:$0xff] }
 0x114   :  { %3496 = vmatmul.mubr.msk.bf16.vlgmr.msra.gmra.mrb[0].mxu1 %vm264_vm1, %v244_v6 }
 0x115   :  { %3500 = vmatpush3.bf16.msra.mxu1 %v3655_v5  ;;  %3507 = vmatprep.mubr.msk.bf16.mxu1 %vm4240_vm0, %v4239_v0  ;;  %v3229_v5 = vld [vmem:[#allocation14 + $0x4] ss:$0 sm:$0xff] }
 0x116   :  { %3501 = vmatprep.subr.bf16.mxu1 %v4239_v0  ;;  %3520 = vmatpush3.bf16.msra.mxu0 %v3661_v27 }
 0x117   :  { %3521 = vmatprep.subr.bf16.mxu0 %v4239_v0 }
 0x119   :  { %3502 = vmatpush3.bf16.msra.mxu1 %v3656_v7 }
 0x11a   :  { %3503 = vmatprep.subr.bf16.mxu1 %v4239_v0  ;;  %3522 = vmatpush3.bf16.msra.mxu0 %v3662_v30 }
 0x11b   :  { %3523 = vmatprep.subr.bf16.mxu0 %v4239_v0 }
 0x11d   :  { %3504 = vmatpush3.bf16.msra.mxu1 %v3657_v8 }
 0x11e   :  { %3505 = vmatprep.subr.bf16.mxu1 %v4239_v0  ;;  %3524 = vmatpush3.bf16.msra.mxu0 %v3663_v31 }
 0x11f   :  { %3541 = vmatprep.subr.bf16.mxu0 %v4239_v0 }
 0x121   :  { %3506 = vmatpush3.bf16.msra.mxu1 %v3659_v12 }
 0x122   :  { %3529 = vmatprep.subr.bf16.mxu1 %v4239_v0 }
 0x1e3   :  { %v452_v25 = vpop.f32.mrb[0].mxu0 }
 0x1e4   :  { %v3515_v26 = vpop.f32.mrb[1].mxu0  ;;  %v453_v36 = vadd.f32 %v3212_v34, %v452_v25 }
 0x1e5   :  { %v455_v28 = vpop.f32.mrb[2].mxu0 }
 0x1e6   :  { %v3516_v29 = vpop.f32.mrb[3].mxu0  ;;  %v456_v41 = vadd.f32 %v3212_v34, %v455_v28  ;;  %v3675_v34 = vld [vmem:[#allocation13 + $0x4] ss:$8 sps:$4 sm:$0xff]  }
 0x1e7   :  { %v302_v16 = vpop.f32.mrb[0].mxu1 }
 0x1e8   :  { %v303_v17 = vadd.f32 %v3202_v15, %v302_v16  ;;  %v3497_v18 = vpop.f32.mrb[1].mxu1 }
 0x1e9   :  { %v305_v19 = vpop.f32.mrb[2].mxu1 }
 0x1ea   :  { %v306_v20 = vadd.f32 %v3202_v15, %v305_v19  ;;  %v3498_v21 = vpop.f32.mrb[3].mxu1  ;;  %v309_v22 = vmax.f32 %v303_v17, 0.0  ;;  %v3235_v15 = vld [vmem:[#allocation11] ss:$0 sm:$0xff] }
 0x1ec   :  { %v310_v23 = vmax.f32 %v306_v20, 0.0 }
 0x1ee   :  { %v319_v24 = vpack.c.bf16 %v310_v23, %v309_v22 }
 0x1f0   :  { %3508 = vmatmul.mubr.msk.bf16.vlgmr.msra.gmra.mrb[4].mxu1 %vm352_vm3, %v319_v24  ;;  %v4611_v24 = vld [vmem:[%s5105_s18] sm:$0xff]  }
 0x1f1   :  { %3537 = vmatprep.mubr.msk.bf16.mxu1 %vm4240_vm0, %v4239_v0  ;;  %3530 = vmatpush3.bf16.msra.mxu1 %v3664_v32 }
 0x1f2   :  { %3531 = vmatprep.subr.bf16.mxu1 %v4239_v0 }
 0x1f5   :  { %3532 = vmatpush3.bf16.msra.mxu1 %v3665_v33 }
 0x1f6   :  { %3533 = vmatprep.subr.bf16.mxu1 %v4239_v0 }
 0x1f9   :  { %3534 = vmatpush3.bf16.msra.mxu1 %v3666_v52 }
 0x1fa   :  { %3535 = vmatprep.subr.bf16.mxu1 %v4239_v0 }
 0x1fd   :  { %3536 = vmatpush3.bf16.msra.mxu1 %v3667_v53 }
 0x1fe   :  { %3553 = vmatprep.subr.bf16.mxu1 %v4239_v0 }
 0x2c3   :  { %v390_v37 = vpop.f32.mrb[4].mxu1 }
 0x2c4   :  { %v391_v38 = vadd.f32 %v3206_v35, %v390_v37  ;;  %v3509_v39 = vpop.f32.mrb[5].mxu1  ;;  %v3676_v37 = vld [vmem:[%s5093_s6 + $0x20] sm:$0xff]  }
 0x2c5   :  { %v393_v40 = vpop.f32.mrb[6].mxu1 }
 0x2c6   :  { %v459_v42 = vmul.f32 %v453_v36, %v391_v38  ;;  %v394_v43 = vadd.f32 %v3206_v35, %v393_v40  ;;  %v3510_v44 = vpop.f32.mrb[7].mxu1  ;;  %v461_v45 = vmax.f32 %v391_v38, 0.0  ;;  %v3673_v35 = vld [vmem:[#allocation13] ss:$8 sps:$4 sm:$0xff]   ;;  %v4241_v36 = vmov 0  }
 0x2c8   :  { %v460_v46 = vmul.f32 %v456_v41, %v394_v43  ;;  %v462_v47 = vmax.f32 %v394_v43, 0.0  ;;  %v463_v48 = vmax.f32 %v459_v42, 0.0 }
 0x2ca   :  { %v464_v49 = vmax.f32 %v460_v46, 0.0  ;;  %v4565_v50 = vpack.c.bf16 %v462_v47, %v461_v45  ;;  %v3677_v47 = vld [vmem:[%s5093_s6 + $0x28] sm:$0xff]  }
 0x2cc   :  { %v473_v51 = vpack.c.bf16 %v464_v49, %v463_v48  ;;  %v3678_v48 = vld [vmem:[%s5093_s6 + $0x30] sm:$0xff]   ;;  %v3679_v49 = vld [vmem:[%s5093_s6 + $0x38] sm:$0xff]  }
 0x2ce   :  { %3526 = vmatmul.mubr.msk.bf16.vlgmr.msra.gmra.mrb[4].mxu0 %vm352_vm3, %v473_v51  ;;  %v3246_v51 = vld [vmem:[#allocation14 + $0x5] ss:$0 sm:$0xff] }
 0x2cf   :  { %3549 = vmatprep.mubr.msk.bf16.mxu0 %vm4240_vm0, %v4239_v0  ;;  %3542 = vmatpush3.bf16.msra.mxu0 %v3668_v54 }
 0x2d0   :  { %3543 = vmatprep.subr.bf16.mxu0 %v4239_v0 }
 0x2d3   :  { %3544 = vmatpush3.bf16.msra.mxu0 %v3669_v55 }
 0x2d4   :  { %3545 = vmatprep.subr.bf16.mxu0 %v4239_v0 }
 0x2d7   :  { %3546 = vmatpush3.bf16.msra.mxu0 %v3670_v3 }
 0x2d8   :  { %3547 = vmatprep.subr.bf16.mxu0 %v4239_v0 }
 0x2db   :  { %3548 = vmatpush3.bf16.msra.mxu0 %v3671_v4 }
 0x2dc   :  { %3559 = vmatprep.subr.bf16.mxu0 %v4239_v0 }
 0x3a1   :  { %v543_v57 = vpop.f32.mrb[4].mxu0 }
 0x3a2   :  { %v544_v58 = vadd.f32 %v3215_v56, %v543_v57  ;;  %v3527_v59 = vpop.f32.mrb[5].mxu0 }
 0x3a3   :  { %v546_v60 = vpop.f32.mrb[6].mxu0 }
 0x3a4   :  { %v547_v61 = vadd.f32 %v3215_v56, %v546_v60  ;;  %v3528_v62 = vpop.f32.mrb[7].mxu0  ;;  %v550_v63 = vmax.f32 %v544_v58, 0.0 }
 0x3a6   :  { %v551_v1 = vmax.f32 %v547_v61, 0.0 }
 0x3a8   :  { %v561_v2 = vpack.c.bf16 %v551_v1, %v550_v63  ;;  %v3255_v63 = vld [vmem:[#allocation11 + $0x1] ss:$0 sm:$0xff] }
 0x3aa   :  { %3538 = vmatmul.mubr.msk.bf16.vlgmr.msra.gmra.mrb[8].mxu1 %vm352_vm3, %v561_v2 }
 0x3ab   :  { %3555 = vmatprep.mubr.msk.bf16.mxu1 %vm4240_vm0, %v4239_v0  ;;  %3554 = vmatpush3.bf16.msra.mxu1 %v4611_v24 }
 0x3ac   :  { %809 = vmatprep.subr.bf16.mxu1 %v3675_v34  ;;  %v3685_v34 = vld [vmem:[%s5093_s6 + $0x50] sm:$0xff]  }
 0x47d   :  { %v631_v6 = vpop.f32.mrb[8].mxu1 }
 0x47e   :  { %v4597_v7 = vadd.f32 %v3229_v5, %v631_v6  ;;  %v3539_v8 = vpop.f32.mrb[9].mxu1 }
 0x47f   :  { %v634_v9 = vpop.f32.mrb[10].mxu1 }
 0x480   :  { %v4599_v10 = vadd.f32 %v3229_v5, %v634_v9  ;;  %v3540_v11 = vpop.f32.mrb[11].mxu1  ;;  %v640_v12 = vmax.f32 %v4597_v7, 0.0 }
 0x482   :  { %v641_v13 = vmax.f32 %v4599_v10, 0.0 }
 0x484   :  { %v650_v14 = vpack.c.bf16 %v641_v13, %v640_v12 }
 0x486   :  { %3550 = vmatmul.mubr.msk.bf16.vlgmr.msra.gmra.mrb[8].mxu0 %vm352_vm3, %v650_v14 }
 0x487   :  { %3567 = vmatprep.mubr.msk.bf16.mxu0 %vm4240_vm0, %v4239_v0  ;;  %3560 = vmatpush3.bf16.msra.mxu0 %v3676_v37 }
 0x488   :  { %3561 = vmatprep.subr.bf16.mxu0 %v4239_v0 }
 0x48b   :  { %3562 = vmatpush3.bf16.msra.mxu0 %v3677_v47 }
 0x48c   :  { %3563 = vmatprep.subr.bf16.mxu0 %v4239_v0 }
 0x48f   :  { %3564 = vmatpush3.bf16.msra.mxu0 %v3678_v48 }
 0x490   :  { %3565 = vmatprep.subr.bf16.mxu0 %v4239_v0 }
 0x493   :  { %3566 = vmatpush3.bf16.msra.mxu0 %v3679_v49 }
 0x494   :  { %3577 = vmatprep.subr.bf16.mxu0 %v4239_v0 }
 0x559   :  { %v719_v16 = vpop.f32.mrb[8].mxu0 }
 0x55a   :  { %v720_v17 = vadd.f32 %v3235_v15, %v719_v16  ;;  %v3551_v18 = vpop.f32.mrb[9].mxu0 }
 0x55b   :  { %v722_v19 = vpop.f32.mrb[10].mxu0 }
 0x55c   :  { %v723_v20 = vadd.f32 %v3235_v15, %v722_v19  ;;  %v3552_v21 = vpop.f32.mrb[11].mxu0  ;;  %v726_v22 = vsel %vm414_vm2, %v720_v17, -inf }
 0x55d   :  { %727 = vmax.xlane.f32.xlu0 %v726_v22  ;;  %v3680_v21 = vld [vmem:[#allocation13 + $0x10] ss:$8 sps:$4 sm:$0xff]   ;;  %v3683_v22 = vld [vmem:[%s5093_s6 + $0x40] sm:$0xff]  }
 0x55e   :  { %v729_v23 = vsel %vm414_vm2, %v723_v20, -inf }
 0x561   :  { %730 = vmax.xlane.f32.xlu0 %v729_v23 }
 0x5ea   :  { %v728_v25 = vpop.xlane.xlu0 %727 }
 0x5eb   :  { %v732_v26 = vsub.f32 %v720_v17, %v728_v25 }
 0x5ed   :  { %v734_v27 = vmul.f32 1.442695, %v732_v26 }
 0x5ee   :  { %v731_v28 = vpop.xlane.xlu0 %730 }
 0x5ef   :  { %v733_v29 = vsub.f32 %v723_v20, %v731_v28  ;;  %3861 = vpow2.f32 %v734_v27  ;;  %v3682_v20 = vld [vmem:[#allocation13 + $0x14] ss:$8 sps:$4 sm:$0xff]  }
 0x5f1   :  { %v736_v30 = vmul.f32 1.442695, %v733_v29 }
 0x5f3   :  { %3863 = vpow2.f32 %v736_v30 }
 0x5f9   :  { %v3862_v31 = vpop.eup %3861 }
 0x5fd   :  { %v3864_v32 = vpop.eup %3863 }
 0x5fe   :  { %v738_v33 = vpack.c.bf16 %v3864_v32, %v3862_v31 }
 0x600   :  { %3556 = vmatmul.mubr.msk.bf16.vlgmr.msra.gmra.mrb[12].mxu1 %vm414_vm2, %v738_v33  ;;  %v3684_v33 = vld [vmem:[%s5093_s6 + $0x48] sm:$0xff]  }
 0x601   :  { %810 = vmatpush1.bf16.msra.mxu1 %v3673_v35  ;;  %841 = vmatprep.mubr.bf16.mxu1 %v4241_v36  ;;  %v3265_v35 = vld [vmem:[#allocation14 + $0x6] ss:$0 sm:$0xff] }
 0x602   :  { %3571 = vmatprep.subr.bf16.mxu1 %v4239_v0 }
 0x6d3   :  { %v782_v38 = vpop.f32.mrb[12].mxu1 }
 0x6d4   :  { %3865 = vrcp.f32 %v782_v38  ;;  %v3557_v39 = vpop.f32.mrb[13].mxu1 }
 0x6d5   :  { %v785_v40 = vpop.f32.mrb[14].mxu1 }
 0x6d6   :  { %3867 = vrcp.f32 %v785_v40  ;;  %v3558_v41 = vpop.f32.mrb[15].mxu1 }
 0x6de   :  { %v3866_v42 = vpop.eup %3865 }
 0x6df   :  { %v791_v44 = vmul.f32 %v3866_v42, %v3862_v31 }
 0x6e0   :  { %v3868_v43 = vpop.eup %3867 }
 0x6e1   :  { %v792_v45 = vmul.f32 %v3868_v43, %v3864_v32 }
 0x6e3   :  { %v4621_v46 = vpack.c.bf16 %v792_v45, %v791_v44 }
 0x6e5   :  { %3245 = vmatmul.mubr.msk.bf16.vlgmr.msra.gmra.mrb[16].mxu1 %vm414_vm2, %v4621_v46 }
 0x6e6   :  { %3572 = vmatpush3.bf16.msra.mxu1 %v4611_v24  ;;  %3573 = vmatprep.mubr.msk.bf16.mxu1 %vm4240_vm0, %v4239_v0 }
 0x6e7   :  { %1030 = vmatprep.subr.bf16.mxu1 %v3682_v20 }
 0x7b8   :  { %v843_v52 = vpop.f32.mrb[16].mxu1 }
 0x7b9   :  { %v860_v53 = vadd.f32 %v3246_v51, %v843_v52  ;;  %1081 = vrot.lane.b32.xlu0 %v843_v52, %s5130_s25  ;;  %v4641_v54 = vpop.f32.mrb[17].mxu1 }
 0x7ba   :  { %v847_v55 = vpop.f32.mrb[18].mxu1 }
 0x7bb   :  { %v862_v56 = vmul.f32 %v860_v53, %v4597_v7  ;;  %v861_v57 = vadd.f32 %v3246_v51, %v847_v55  ;;  %v4644_v58 = vpop.f32.mrb[19].mxu1 }
 0x7bd   :  { %v863_v59 = vmul.f32 %v861_v57, %v4599_v10  ;;  %v864_v60 = vmax.f32 %v862_v56, 0.0 }
 0x7bf   :  { %v865_v61 = vmax.f32 %v863_v59, 0.0 }
 0x7c1   :  { %v875_v62 = vpack.c.bf16 %v865_v61, %v864_v60 }
 0x7c3   :  { %3568 = vmatmul.mubr.msk.bf16.vlgmr.msra.gmra.mrb[12].mxu0 %vm352_vm3, %v875_v62 }
 0x7c4   :  { %3585 = vmatprep.mubr.msk.bf16.mxu0 %vm4240_vm0, %v4239_v0  ;;  %3578 = vmatpush3.bf16.msra.mxu0 %v3683_v22 }
 0x7c5   :  { %3579 = vmatprep.subr.bf16.mxu0 %v4239_v0 }
 0x7c8   :  { %3580 = vmatpush3.bf16.msra.mxu0 %v3684_v33  ;;  %v3696_v33 = vld [vmem:[%s5097_s10 + $0x20] ss:$8 sps:$4 sm:$0xff]  }
 0x7c9   :  { %3581 = vmatprep.subr.bf16.mxu0 %v4239_v0 }
 0x7cc   :  { %3582 = vmatpush3.bf16.msra.mxu0 %v3685_v34  ;;  %v3701_v34 = vld [vmem:[%s5097_s10 + $0x34] ss:$8 sps:$4 sm:$0xff]  }
 0x7cd   :  { %3583 = vmatprep.subr.bf16.mxu0 %v4239_v0 }
 0x82b   :  { %v1082_v37 = vpop.permute.xlu0 %1081 }
 0x82c   :  { %v1087_v39 = vadd.f32 %v3265_v35, %v1082_v37  ;;  %v3699_v37 = vld [vmem:[%s5097_s10 + $0x30] ss:$8 sps:$4 sm:$0xff]  }
 0x896   :  { %v945_v1 = vpop.f32.mrb[12].mxu0 }
 0x897   :  { %v946_v2 = vadd.f32 %v3255_v63, %v945_v1  ;;  %v3569_v3 = vpop.f32.mrb[13].mxu0 }
 0x898   :  { %v948_v4 = vpop.f32.mrb[14].mxu0 }
 0x899   :  { %v949_v5 = vadd.f32 %v3255_v63, %v948_v4  ;;  %v3570_v6 = vpop.f32.mrb[15].mxu0  ;;  %v952_v8 = vsel %vm414_vm2, %v946_v2, -inf }
 0x89a   :  { %953 = vmax.xlane.f32.xlu1 %v952_v8 }
 0x89b   :  { %v955_v9 = vsel %vm414_vm2, %v949_v5, -inf }
 0x89e   :  { %956 = vmax.xlane.f32.xlu1 %v955_v9 }
 0x8af   :  { %1083 = vrot.lane.b32.xlu1 %v847_v55, %s5130_s25  ;;  %v3274_v55 = vld [vmem:[#allocation11 + $0x2] ss:$0 sm:$0xff] }
 0x927   :  { %v954_v11 = vpop.xlane.xlu1 %953 }
 0x928   :  { %v958_v12 = vsub.f32 %v946_v2, %v954_v11 }
 0x92a   :  { %v960_v13 = vmul.f32 1.442695, %v958_v12 }
 0x92b   :  { %v957_v14 = vpop.xlane.xlu1 %956 }
 0x92c   :  { %v959_v15 = vsub.f32 %v949_v5, %v957_v14  ;;  %3869 = vpow2.f32 %v960_v13  ;;  %v3689_v13 = vld [vmem:[#allocation13 + $0x24] ss:$8 sps:$4 sm:$0xff]   ;;  %v3687_v14 = vld [vmem:[#allocation13 + $0x20] ss:$8 sps:$4 sm:$0xff]  }
 0x92e   :  { %v962_v16 = vmul.f32 1.442695, %v959_v15  ;;  %v3692_v15 = vld [vmem:[%s5097_s10 + $0x4] ss:$8 sps:$4 sm:$0xff]  }
 0x92f   :  { %v1084_v38 = vpop.permute.xlu1 %1083 }
 0x930   :  { %3871 = vpow2.f32 %v962_v16  ;;  %v1088_v41 = vadd.f32 %v3265_v35, %v1084_v38  ;;  %v3702_v16 = vld [vmem:[%s5093_s6 + $0x60] sm:$0xff]  }
 0x931   :  { %v1439_v35 = vld [vmem:[#allocation22 + $0x28] sm:$0xff] }
 0x936   :  { %v3870_v17 = vpop.eup %3869 }
 0x93a   :  { %v3872_v18 = vpop.eup %3871 }
 0x93b   :  { %v964_v19 = vpack.c.bf16 %v3872_v18, %v3870_v17 }
 0x93d   :  { %3574 = vmatmul.mubr.msk.bf16.vlgmr.msra.gmra.mrb[20].mxu1 %vm414_vm2, %v964_v19 }
 0x93e   :  { %1062 = vmatprep.mubr.bf16.mxu1 %v4241_v36  ;;  %1031 = vmatpush1.bf16.msra.mxu1 %v3680_v21 }
 0x93f   :  { %3589 = vmatprep.subr.bf16.mxu1 %v4239_v0 }
 0xa10   :  { %v1002_v23 = vpop.f32.mrb[20].mxu1 }
 0xa11   :  { %3873 = vrcp.f32 %v1002_v23  ;;  %v3575_v25 = vpop.f32.mrb[21].mxu1 }
 0xa12   :  { %v1005_v26 = vpop.f32.mrb[22].mxu1 }
 0xa13   :  { %3875 = vrcp.f32 %v1005_v26  ;;  %v3576_v27 = vpop.f32.mrb[23].mxu1 }
 0xa14   :  { %v3690_v27 = vld [vmem:[%s5097_s10] ss:$8 sps:$4 sm:$0xff]  }
 0xa1b   :  { %v3874_v28 = vpop.eup %3873 }
 0xa1c   :  { %v1011_v30 = vmul.f32 %v3874_v28, %v3870_v17  ;;  %v3703_v17 = vld [vmem:[%s5093_s6 + $0x68] sm:$0xff]  }
 0xa1d   :  { %v3876_v29 = vpop.eup %3875 }
 0xa1e   :  { %v1012_v31 = vmul.f32 %v3876_v29, %v3872_v18  ;;  %v3695_v29 = vld [vmem:[%s5097_s10 + $0x14] ss:$8 sps:$4 sm:$0xff]  }
 0xa20   :  { %v4660_v32 = vpack.c.bf16 %v1012_v31, %v1011_v30  ;;  %v3693_v30 = vld [vmem:[%s5097_s10 + $0x10] ss:$8 sps:$4 sm:$0xff]   ;;  %v3698_v31 = vld [vmem:[%s5097_s10 + $0x24] ss:$8 sps:$4 sm:$0xff]  }
 0xa22   :  { %3264 = vmatmul.mubr.msk.bf16.vlgmr.msra.gmra.mrb[24].mxu1 %vm414_vm2, %v4660_v32 }
 0xa23   :  { %3590 = vmatpush3.bf16.msra.mxu1 %v4611_v24  ;;  %3591 = vmatprep.mubr.msk.bf16.mxu1 %vm4240_vm0, %v4239_v0  ;;  %v3686_v24 = vld [vmem:[%s5093_s6 + $0x58] sm:$0xff]  }
 0xa24   :  { %3584 = vmatpush3.bf16.msra.mxu0 %v3686_v24  ;;  %1259 = vmatprep.subr.bf16.mxu1 %v3689_v13  ;;  %v1435_v24 = vld [vmem:[#allocation22 + $0x8] sm:$0xff] }
 0xa25   :  { %3595 = vmatprep.subr.bf16.mxu0 %v4239_v0  ;;  %v4727_v38 = vcombine.high %v1435_v24, %v1439_v35 }
 0xaf5   :  { %v1064_v40 = vpop.f32.mrb[24].mxu1 }
 0xaf6   :  { %v1089_v42 = vadd.f32 %v1087_v39, %v1064_v40  ;;  %v1066_v43 = vpop.f32.mrb[25].mxu1  ;;  %v1437_v39 = vld [vmem:[#allocation22 + $0x18] sm:$0xff] }
 0xaf7   :  { %v1067_v44 = vpop.f32.mrb[26].mxu1  ;;  %v1434_v43 = vld [vmem:[#allocation22] sm:$0xff] }
 0xaf8   :  { %v1091_v45 = vmul.f32 %v1089_v42, %v4597_v7  ;;  %v1090_v47 = vadd.f32 %v1088_v41, %v1067_v44  ;;  %v1069_v48 = vpop.f32.mrb[27].mxu1  ;;  %v4729_v41 = vcombine.low %v1435_v24, %v1439_v35  ;;  %v3714_v24 = vld [vmem:[#allocation17 + $0x24] ss:$8 sps:$4 sm:$0xff]  }
 0xaf9   :  { %v1436_v48 = vld [vmem:[#allocation22 + $0x10] sm:$0xff] }
 0xafa   :  { %v1092_v49 = vmul.f32 %v1090_v47, %v4599_v10  ;;  %v1093_v51 = vmax.f32 %v1091_v45, 0.0 }
 0xafc   :  { %v1094_v52 = vmax.f32 %v1092_v49, 0.0  ;;  %v1440_v49 = vld [vmem:[#allocation22 + $0x30] sm:$0xff] }
 0xafe   :  { %v1104_v53 = vpack.c.bf16 %v1094_v52, %v1093_v51  ;;  %v4755_v51 = vcombine.high %v1436_v48, %v1440_v49  ;;  %v4762_v52 = vcombine.low %v1436_v48, %v1440_v49  ;;  %v3715_v48 = vld [vmem:[#allocation17 + $0x30] ss:$8 sps:$4 sm:$0xff]  }
 0xb00   :  { %3586 = vmatmul.mubr.msk.bf16.vlgmr.msra.gmra.mrb[16].mxu0 %vm352_vm3, %v1104_v53  ;;  %v3704_v53 = vld [vmem:[%s5093_s6 + $0x70] sm:$0xff]  }
 0xb01   :  { %3603 = vmatprep.mubr.msk.bf16.mxu0 %vm4240_vm0, %v4239_v0  ;;  %3596 = vmatpush3.bf16.msra.mxu0 %v3702_v16 }
 0xb02   :  { %3597 = vmatprep.subr.bf16.mxu0 %v4239_v0 }
 0xb05   :  { %3598 = vmatpush3.bf16.msra.mxu0 %v3703_v17 }
 0xb06   :  { %3599 = vmatprep.subr.bf16.mxu0 %v4239_v0 }
 0xb09   :  { %3600 = vmatpush3.bf16.msra.mxu0 %v3704_v53  ;;  %v3718_v53 = vld [vmem:[#allocation17 + $0x40] ss:$8 sps:$4 sm:$0xff]  }
 0xb0a   :  { %3601 = vmatprep.subr.bf16.mxu0 %v4239_v0 }
 0xbd3   :  { %v1174_v56 = vpop.f32.mrb[16].mxu0 }
 0xbd4   :  { %v1175_v57 = vadd.f32 %v3274_v55, %v1174_v56  ;;  %v3587_v59 = vpop.f32.mrb[17].mxu0  ;;  %v3284_v56 = vld [vmem:[#allocation14 + $0x7] ss:$0 sm:$0xff] }
 0xbd5   :  { %v1177_v60 = vpop.f32.mrb[18].mxu0  ;;  %v1308_v59 = vadd.f32 %v3284_v56, %v4641_v54 }
 0xbd6   :  { %v1178_v61 = vadd.f32 %v3274_v55, %v1177_v60  ;;  %v3588_v62 = vpop.f32.mrb[19].mxu0  ;;  %v1181_v63 = vsel %vm414_vm2, %v1175_v57, -inf  ;;  %v3705_v55 = vld [vmem:[%s5093_s6 + $0x78] sm:$0xff]  }
 0xbd7   :  { %1182 = vmax.xlane.f32.xlu1 %v1181_v63  ;;  %3602 = vmatpush3.bf16.msra.mxu0 %v3705_v55 }
 0xbd8   :  { %v1184_v1 = vsel %vm414_vm2, %v1178_v61, -inf }
 0xbd9   :  { %1185 = vmax.xlane.f32.xlu0 %v1184_v1 }
 0xbe8   :  { %1314 = vrot.lane.b32.xlu1 %v1067_v44, %s5130_s25  ;;  %v1438_v44 = vld [vmem:[#allocation22 + $0x20] sm:$0xff] }
 0xbe9   :  { %v4741_v47 = vcombine.high %v1434_v43, %v1438_v44 }
 0xbeb   :  { %1589 = vmatprep.subr.bf16.mxu0 %v4741_v47 }
 0xbef   :  { %1312 = vrot.lane.b32.xlu0 %v1064_v40, %s5130_s25  ;;  %v1441_v40 = vld [vmem:[#allocation22 + $0x38] sm:$0xff] }
 0xbf0   :  { %v4732_v42 = vcombine.high %v1437_v39, %v1441_v40  ;;  %v4739_v45 = vcombine.low %v1437_v39, %v1441_v40  ;;  %v3717_v40 = vld [vmem:[#allocation17 + $0x34] ss:$8 sps:$4 sm:$0xff]  }
 0xc64   :  { %v1183_v2 = vpop.xlane.xlu1 %1182 }
 0xc65   :  { %v1187_v3 = vsub.f32 %v1175_v57, %v1183_v2 }
 0xc66   :  { %v1186_v4 = vpop.xlane.xlu0 %1185 }
 0xc67   :  { %v1189_v5 = vmul.f32 1.442695, %v1187_v3  ;;  %v1188_v6 = vsub.f32 %v1178_v61, %v1186_v4  ;;  %v1453_v3 = vlaneseq }
 0xc68   :  { %v1315_v60 = vpop.permute.xlu1 %1314 }
 0xc69   :  { %v1191_v8 = vmul.f32 1.442695, %v1188_v6  ;;  %3877 = vpow2.f32 %v1189_v5 }
 0xc6a   :  { %v1313_v57 = vpop.permute.xlu0 %1312 }
 0xc6b   :  { %3879 = vpow2.f32 %v1191_v8  ;;  %v1318_v61 = vadd.f32 %v1313_v57, %v1308_v59 }
 0xc73   :  { %v3878_v9 = vpop.eup %3877 }
 0xc75   :  { %v3880_v11 = vpop.eup %3879 }
 0xc76   :  { %v1193_v12 = vpack.c.bf16 %v3880_v11, %v3878_v9 }
 0xc78   :  { %3592 = vmatmul.mubr.msk.bf16.vlgmr.msra.gmra.mrb[28].mxu1 %vm414_vm2, %v1193_v12 }
 0xc79   :  { %1291 = vmatprep.mubr.bf16.mxu1 %v4241_v36  ;;  %1260 = vmatpush1.bf16.msra.mxu1 %v3687_v14 }
 0xc7a   :  { %1506 = vmatprep.subr.bf16.mxu1 %v3692_v15 }
 0xd4b   :  { %v1231_v18 = vpop.f32.mrb[28].mxu1 }
 0xd4c   :  { %3881 = vrcp.f32 %v1231_v18  ;;  %v3593_v19 = vpop.f32.mrb[29].mxu1 }
 0xd4d   :  { %v1234_v20 = vpop.f32.mrb[30].mxu1  ;;  %v3708_v19 = vld [vmem:[#allocation17 + $0x4] ss:$8 sps:$4 sm:$0xff]  }
 0xd4e   :  { %3883 = vrcp.f32 %v1234_v20  ;;  %v3594_v21 = vpop.f32.mrb[31].mxu1 }
 0xd56   :  { %v3882_v22 = vpop.eup %3881 }
 0xd57   :  { %v1240_v25 = vmul.f32 %v3882_v22, %v3878_v9 }
 0xd58   :  { %v3884_v23 = vpop.eup %3883 }
 0xd59   :  { %v1241_v26 = vmul.f32 %v3884_v23, %v3880_v11  ;;  %v1454_v11 = vshrl.u32 %v1453_v3, 7 }
 0xd5b   :  { %v4704_v28 = vpack.c.bf16 %v1241_v26, %v1240_v25  ;;  %v4788_v14 = vsub.s32 0, %v1454_v11  ;;  %v4790_v15 = vsub.s32 1, %v1454_v11  ;;  %v3706_v26 = vld [vmem:[#allocation17] ss:$8 sps:$4 sm:$0xff]  }
 0xd5d   :  { %3283 = vmatmul.mubr.msk.bf16.vlgmr.msra.gmra.mrb[32].mxu1 %vm414_vm2, %v4704_v28 }
 0xd5e   :  { %1507 = vmatpush1.bf16.msra.mxu1 %v3690_v27  ;;  %1538 = vmatprep.mubr.bf16.mxu1 %v4241_v36 }
 0xd5f   :  { %1508 = vmatprep.subr.bf16.mxu1 %v3695_v29 }
 0xd62   :  { %1509 = vmatpush1.bf16.msra.mxu1 %v3693_v30  ;;  %v3711_v30 = vld [vmem:[#allocation17 + $0x14] ss:$8 sps:$4 sm:$0xff]  }
 0xd63   :  { %1510 = vmatprep.subr.bf16.mxu1 %v3698_v31 }
 0xd66   :  { %1511 = vmatpush1.bf16.msra.mxu1 %v3696_v33 }
 0xd67   :  { %1512 = vmatprep.subr.bf16.mxu1 %v3701_v34  ;;  %v3709_v34 = vld [vmem:[#allocation17 + $0x10] ss:$8 sps:$4 sm:$0xff]  }
 0xd6a   :  { %1513 = vmatpush1.bf16.msra.mxu1 %v3699_v37  ;;  %v3712_v37 = vld [vmem:[#allocation17 + $0x20] ss:$8 sps:$4 sm:$0xff]  }
 0xd6b   :  { %1632 = vmatprep.subr.bf16.mxu1 %v4727_v38 }
 0xd6d   :  { %3307 = vmatmul.mubr.msk.bf16.vlgmr.msra.gmra.mrb[36].mxu1 %vm352_vm3, %v4565_v50  ;;  %v4748_v50 = vcombine.low %v1434_v43, %v1438_v44 }
 0xd6e   :  { %1633 = vmatpush1.bf16.msra.mxu1 %v4729_v41  ;;  %1664 = vmatprep.mubr.bf16.mxu1 %v4241_v36 }
 0xd6f   :  { %1718 = vmatprep.subr.bf16.mxu1 %v4732_v42 }
 0xd75   :  { %3317 = vmatmul.mubr.msk.bf16.vlgmr.msra.gmra.mrb[40].mxu1 %vm414_vm2, %v4621_v46 }
 0xd76   :  { %1719 = vmatpush1.bf16.msra.mxu1 %v4739_v45  ;;  %1750 = vmatprep.mubr.bf16.mxu1 %v4241_v36 }
 0xd77   :  { %2057 = vmatprep.subr.bf16.mxu1 %v4741_v47 }
 0xd7d   :  { %3319 = vmatmul.mubr.msk.bf16.vlgmr.msra.gmra.mrb[44].mxu1 %vm414_vm2, %v4621_v46 }
 0xd7e   :  { %2058 = vmatpush1.bf16.msra.mxu1 %v4748_v50  ;;  %2089 = vmatprep.mubr.bf16.mxu1 %v4241_v36 }
 0xd7f   :  { %2100 = vmatprep.subr.bf16.mxu1 %v4727_v38 }
 0xd85   :  { %3352 = vmatmul.mubr.msk.bf16.vlgmr.msra.gmra.mrb[48].mxu1 %vm414_vm2, %v4660_v32 }
 0xd86   :  { %2101 = vmatpush1.bf16.msra.mxu1 %v4729_v41  ;;  %2132 = vmatprep.mubr.bf16.mxu1 %v4241_v36 }
 0xd87   :  { %2143 = vmatprep.subr.bf16.mxu1 %v4755_v51 }
 0xd8d   :  { %3353 = vmatmul.mubr.msk.bf16.vlgmr.msra.gmra.mrb[52].mxu1 %vm414_vm2, %v4660_v32 }
 0xd8e   :  { %2144 = vmatpush1.bf16.msra.mxu1 %v4762_v52  ;;  %2175 = vmatprep.mubr.bf16.mxu1 %v4241_v36 }
 0xd8f   :  { %2186 = vmatprep.subr.bf16.mxu1 %v4732_v42 }
 0xd95   :  { %3354 = vmatmul.mubr.msk.bf16.vlgmr.msra.gmra.mrb[56].mxu1 %vm414_vm2, %v4660_v32 }
 0xd96   :  { %2187 = vmatpush1.bf16.msra.mxu1 %v4739_v45  ;;  %2218 = vmatprep.mubr.bf16.mxu1 %v4241_v36 }
 0xd9d   :  { %3355 = vmatmul.mubr.msk.bf16.vlgmr.msra.gmra.mrb[60].mxu1 %vm414_vm2, %v4660_v32  ;;  %v1309_v32 = vadd.f32 %v3284_v56, %v4644_v58  ;;  %v1451_v58 = vld [vmem:[#allocation16] sm:$0x3] }
 0xd9e   :  { %v3723_v56 = vld [vmem:[#allocation17 + $0x54] ss:$8 sps:$4 sm:$0xff]  }
 0xd9f   :  { %v1319_v63 = vadd.f32 %v1315_v60, %v1309_v32  ;;  %v3721_v60 = vld [vmem:[#allocation17 + $0x50] ss:$8 sps:$4 sm:$0xff]   ;;  %v3726_v32 = vld [vmem:[#allocation17 + $0x64] ss:$8 sps:$4 sm:$0xff]  }
 0xe30   :  { %v1293_v62 = vpop.f32.mrb[32].mxu1 }
 0xe31   :  { %v1320_v1 = vadd.f32 %v1318_v61, %v1293_v62  ;;  %v1295_v2 = vpop.f32.mrb[33].mxu1  ;;  %v3724_v62 = vld [vmem:[#allocation17 + $0x60] ss:$8 sps:$4 sm:$0xff]  }
 0xe32   :  { %v1296_v4 = vpop.f32.mrb[34].mxu1 }
 0xe33   :  { %v1322_v5 = vmul.f32 %v1320_v1, %v4597_v7  ;;  %v1321_v6 = vadd.f32 %v1319_v63, %v1296_v4  ;;  %v1298_v8 = vpop.f32.mrb[35].mxu1  ;;  %v1456_v7 = vrot.slane %v1451_v58, %v4788_v14  ;;  %v3729_v1 = vld [vmem:[#allocation17 + $0x74] ss:$8 sps:$4 sm:$0xff]  }
 0xe35   :  { %v1323_v9 = vmul.f32 %v1321_v6, %v4599_v10  ;;  %v1324_v12 = vmax.f32 %v1322_v5, 0.0  ;;  %v1460_v10 = vrot.slane %v1451_v58, %v4790_v15  ;;  %v3727_v5 = vld [vmem:[#allocation17 + $0x70] ss:$8 sps:$4 sm:$0xff]   ;;  %v3732_v6 = vld [vmem:[#allocation17 + $0x84] ss:$8 sps:$4 sm:$0xff]  }
 0xe37   :  { %v1325_v54 = vmax.f32 %v1323_v9, 0.0  ;;  %v3730_v9 = vld [vmem:[#allocation17 + $0x80] ss:$8 sps:$4 sm:$0xff]  }
 0xe39   :  { %v1335_v13 = vpack.c.bf16 %v1325_v54, %v1324_v12 }
 0xe3b   :  { %3604 = vmatmul.mubr.msk.bf16.vlgmr.msra.gmra.mrb[20].mxu0 %vm352_vm3, %v1335_v13 }
 0xe3c   :  { %1590 = vmatpush1.bf16.msra.mxu0 %v4748_v50  ;;  %1621 = vmatprep.mubr.bf16.mxu0 %v4241_v36 }
 0xe3d   :  { %1675 = vmatprep.subr.bf16.mxu0 %v4755_v51 }
 0xe40   :  { %v1540_v16 = vpop.f32.mrb[36].mxu1 }
 0xe41   :  { %v4798_v17 = vadd.f32 %v1540_v16, %v1456_v7  ;;  %v1542_v18 = vpop.f32.mrb[37].mxu1  ;;  %v3735_v16 = vld [vmem:[#allocation17 + $0x94] ss:$8 sps:$4 sm:$0xff]  }
 0xe42   :  { %v4800_v20 = vadd.f32 %v1542_v18, %v1460_v10  ;;  %v1544_v21 = vpop.f32.mrb[38].mxu1  ;;  %v3733_v18 = vld [vmem:[#allocation17 + $0x90] ss:$8 sps:$4 sm:$0xff]  }
 0xe43   :  { %v1546_v22 = vpop.f32.mrb[39].mxu1  ;;  %1765 = vrot.lane.b32.xlu1 %v4798_v17, %s5130_s25  ;;  %3316 = vmatmul.mubr.msk.bf16.vlgmr.msra.gmra.mrb[24].mxu0 %vm414_vm2, %v4621_v46  ;;  %v4809_v23 = vadd.f32 %v1544_v21, %v1456_v7  ;;  %v3736_v21 = vld [vmem:[#allocation17 + $0xa0] ss:$8 sps:$4 sm:$0xff]  }
 0xe44   :  { %1676 = vmatpush1.bf16.msra.mxu0 %v4762_v52  ;;  %1769 = vrot.lane.b32.xlu0 %v4800_v20, %s5130_s25  ;;  %v4816_v27 = vadd.f32 %v1546_v22, %v1460_v10  ;;  %v3741_v22 = vld [vmem:[#allocation17 + $0xb4] ss:$8 sps:$4 sm:$0xff]  }
 0xe45   :  { %1707 = vmatprep.mubr.bf16.mxu0 %v4241_v36  ;;  %2014 = vmatprep.subr.bf16.mxu0 %v3708_v19  ;;  %v3738_v19 = vld [vmem:[#allocation17 + $0xa4] ss:$8 sps:$4 sm:$0xff]  }
 0xe47   :  { %1767 = vrot.lane.b32.xlu1 %v4809_v23, %s5130_s25 }
 0xe48   :  { %v4814_v25 = vpop.f32.mrb[40].mxu1 }
 0xe49   :  { %v4818_v29 = vpop.f32.mrb[41].mxu1 }
 0xe4a   :  { %v4820_v31 = vpop.f32.mrb[42].mxu1 }
 0xe4b   :  { %v4822_v33 = vpop.f32.mrb[43].mxu1  ;;  %1771 = vrot.lane.b32.xlu1 %v4816_v27, %s5130_s25  ;;  %3318 = vmatmul.mubr.msk.bf16.vlgmr.msra.gmra.mrb[28].mxu0 %vm414_vm2, %v4621_v46  ;;  %v3720_v46 = vld [vmem:[#allocation17 + $0x44] ss:$8 sps:$4 sm:$0xff]  }
 0xe4c   :  { %2015 = vmatpush1.bf16.msra.mxu0 %v3706_v26  ;;  %v3739_v26 = vld [vmem:[#allocation17 + $0xb0] ss:$8 sps:$4 sm:$0xff]  }
 0xe4d   :  { %2016 = vmatprep.subr.bf16.mxu0 %v3711_v30  ;;  %v3742_v30 = vld [vmem:[#allocation17 + $0xc0] ss:$8 sps:$4 sm:$0xff]  }
 0xe50   :  { %v4828_v35 = vpop.f32.mrb[44].mxu1  ;;  %2017 = vmatpush1.bf16.msra.mxu0 %v3709_v34  ;;  %v3744_v34 = vld [vmem:[#allocation17 + $0xc4] ss:$8 sps:$4 sm:$0xff]  }
 0xe51   :  { %v4830_v39 = vpop.f32.mrb[45].mxu1  ;;  %2018 = vmatprep.subr.bf16.mxu0 %v3714_v24  ;;  %v3747_v24 = vld [vmem:[#allocation17 + $0xd4] ss:$8 sps:$4 sm:$0xff]  }
 0xe52   :  { %v4832_v43 = vpop.f32.mrb[46].mxu1 }
 0xe53   :  { %v4834_v44 = vpop.f32.mrb[47].mxu1 }
 0xe54   :  { %2019 = vmatpush1.bf16.msra.mxu0 %v3712_v37  ;;  %v3745_v37 = vld [vmem:[#allocation17 + $0xd0] ss:$8 sps:$4 sm:$0xff]  }
 0xe55   :  { %2020 = vmatprep.subr.bf16.mxu0 %v3717_v40  ;;  %v3750_v40 = vld [vmem:[#allocation17 + $0xe4] ss:$8 sps:$4 sm:$0xff]  }
 0xe58   :  { %v4836_v49 = vpop.f32.mrb[48].mxu1  ;;  %2021 = vmatpush1.bf16.msra.mxu0 %v3715_v48  ;;  %v3748_v48 = vld [vmem:[#allocation17 + $0xe0] ss:$8 sps:$4 sm:$0xff]  }
 0xe59   :  { %v4838_v55 = vpop.f32.mrb[49].mxu1  ;;  %2022 = vmatprep.subr.bf16.mxu0 %v3720_v46  ;;  %v3753_v46 = vld [vmem:[#allocation17 + $0xf4] ss:$8 sps:$4 sm:$0xff]  }
 0xe5a   :  { %v4840_v57 = vpop.f32.mrb[50].mxu1 }
 0xe5b   :  { %v4842_v59 = vpop.f32.mrb[51].mxu1 }
 0xe5c   :  { %2023 = vmatpush1.bf16.msra.mxu0 %v3718_v53  ;;  %v3751_v53 = vld [vmem:[#allocation17 + $0xf0] ss:$8 sps:$4 sm:$0xff]  }
 0xe5d   :  { %2024 = vmatprep.subr.bf16.mxu0 %v3723_v56 }
 0xe60   :  { %v4844_v61 = vpop.f32.mrb[52].mxu1  ;;  %2025 = vmatpush1.bf16.msra.mxu0 %v3721_v60  ;;  %v4870_v60 = vand.u32 127, %v1453_v3 }
 0xe61   :  { %v4846_v63 = vpop.f32.mrb[53].mxu1  ;;  %2026 = vmatprep.subr.bf16.mxu0 %v3726_v32 }
 0xe62   :  { %v4848_v2 = vpop.f32.mrb[54].mxu1  ;;  %vm1775_vm4 = vcmp.lt.s32.totalorder %v4870_v60, 64 }
 0xe63   :  { %v4850_v4 = vpop.f32.mrb[55].mxu1 }
 0xe64   :  { %2027 = vmatpush1.bf16.msra.mxu0 %v3724_v62 }
 0xe65   :  { %2028 = vmatprep.subr.bf16.mxu0 %v3729_v1 }
 0xe68   :  { %v4852_v8 = vpop.f32.mrb[56].mxu1  ;;  %2029 = vmatpush1.bf16.msra.mxu0 %v3727_v5 }
 0xe69   :  { %v4854_v11 = vpop.f32.mrb[57].mxu1  ;;  %2030 = vmatprep.subr.bf16.mxu0 %v3732_v6 }
 0xe6a   :  { %v4856_v12 = vpop.f32.mrb[58].mxu1 }
 0xe6b   :  { %v4858_v54 = vpop.f32.mrb[59].mxu1 }
 0xe6c   :  { %2031 = vmatpush1.bf16.msra.mxu0 %v3730_v9 }
 0xe6d   :  { %2032 = vmatprep.subr.bf16.mxu0 %v3735_v16 }
 0xe70   :  { %v4860_v13 = vpop.f32.mrb[60].mxu1  ;;  %2033 = vmatpush1.bf16.msra.mxu0 %v3733_v18 }
 0xe71   :  { %v4862_v58 = vpop.f32.mrb[61].mxu1  ;;  %2034 = vmatprep.subr.bf16.mxu0 %v3738_v19 }
 0xe72   :  { %v4864_v7 = vpop.f32.mrb[62].mxu1 }
 0xe73   :  { %v4866_v10 = vpop.f32.mrb[63].mxu1 }
 0xe74   :  { %2035 = vmatpush1.bf16.msra.mxu0 %v3736_v21 }
 0xe75   :  { %2036 = vmatprep.subr.bf16.mxu0 %v3741_v22 }
 0xe78   :  { %2037 = vmatpush1.bf16.msra.mxu0 %v3739_v26 }
 0xe79   :  { %2038 = vmatprep.subr.bf16.mxu0 %v3744_v34 }
 0xe7c   :  { %2039 = vmatpush1.bf16.msra.mxu0 %v3742_v30 }
 0xe7d   :  { %2040 = vmatprep.subr.bf16.mxu0 %v3747_v24 }
 0xe80   :  { %2041 = vmatpush1.bf16.msra.mxu0 %v3745_v37 }
 0xe81   :  { %2042 = vmatprep.subr.bf16.mxu0 %v3750_v40 }
 0xe84   :  { %2043 = vmatpush1.bf16.msra.mxu0 %v3748_v48 }
 0xe85   :  { %2044 = vmatprep.subr.bf16.mxu0 %v3753_v46 }
 0xe88   :  { %2045 = vmatpush1.bf16.msra.mxu0 %v3751_v53 }
 0xe89   :  { %2524 = vmatprep.subr.bf16.mxu0 %v4741_v47 }
 0xeb5   :  { %v1766_v56 = vpop.permute.xlu1 %1765 }
 0xeb6   :  { %v1770_v6 = vpop.permute.xlu0 %1769 }
 0xeb7   :  { %v1778_v18 = vsel %vm1775_vm4, %v1770_v6, %v1766_v56  ;;  %v1776_v47 = vsel %vm1775_vm4, %v1766_v56, %v1770_v6 }
 0xeb8   :  { %v1780_v21 = vmul.f32 %v1778_v18, %v4814_v25  ;;  %v1781_v34 = vmul.f32 %v1776_v47, %v4818_v29 }
 0xeb9   :  { %v1768_v32 = vpop.permute.xlu1 %1767 }
 0xebd   :  { %v1772_v16 = vpop.permute.xlu1 %1771 }
 0xebe   :  { %v1779_v3 = vsel %vm1775_vm4, %v1772_v16, %v1768_v32  ;;  %v1777_v22 = vsel %vm1775_vm4, %v1768_v32, %v1772_v16 }
 0xebf   :  { %v1782_v40 = vmul.f32 %v1779_v3, %v4820_v31  ;;  %v1783_v56 = vmul.f32 %v1777_v22, %v4822_v33  ;;  %v1796_v31 = vmul.f32 %v1776_v47, %v4828_v35  ;;  %v1797_v33 = vmul.f32 %v1778_v18, %v4830_v39  ;;  %v3763_v39 = vld [vmem:[#allocation17 + $0x130] ss:$8 sps:$4 sm:$0xff]   ;;  %v3774_v18 = vld [vmem:[#allocation17 + $0x164] ss:$8 sps:$4 sm:$0xff]  }
 0xf0e   :  { %v4872_v62 = vpop.f32.mrb[20].mxu0 }
 0xf0f   :  { %v3605_v1 = vpop.f32.mrb[21].mxu0 }
 0xf10   :  { %v4874_v5 = vpop.f32.mrb[22].mxu0 }
 0xf11   :  { %v3606_v9 = vpop.f32.mrb[23].mxu0 }
 0xf16   :  { %v1623_v19 = vpop.f32.mrb[24].mxu0 }
 0xf17   :  { %v1761_v26 = vmul.f32 %v1623_v19, %v4798_v17  ;;  %v1625_v30 = vpop.f32.mrb[25].mxu0 }
 0xf18   :  { %v1762_v24 = vmul.f32 %v1625_v30, %v4800_v20  ;;  %v1627_v37 = vpop.f32.mrb[26].mxu0 }
 0xf19   :  { %v1784_v48 = vadd.f32 %v1780_v21, %v1761_v26  ;;  %v1763_v46 = vmul.f32 %v1627_v37, %v4809_v23  ;;  %v1629_v53 = vpop.f32.mrb[27].mxu0 }
 0xf1a   :  { %v1785_v25 = vadd.f32 %v1781_v34, %v1762_v24  ;;  %v1764_v1 = vmul.f32 %v1629_v53, %v4816_v27 }
 0xf1b   :  { %v1786_v32 = vadd.f32 %v1782_v40, %v1763_v46  ;;  %v1798_v40 = vmul.f32 %v1777_v22, %v4832_v43  ;;  %v3766_v43 = vld [vmem:[#allocation17 + $0x140] ss:$8 sps:$4 sm:$0xff]   ;;  %v3777_v22 = vld [vmem:[#allocation17 + $0x174] ss:$8 sps:$4 sm:$0xff]  }
 0xf1c   :  { %v1787_v6 = vadd.f32 %v1783_v56, %v1764_v1 }
 0xf1e   :  { %v1709_v9 = vpop.f32.mrb[28].mxu0 }
 0xf1f   :  { %v1788_v16 = vmul.f32 %v1709_v9, %v4800_v20  ;;  %v1711_v29 = vpop.f32.mrb[29].mxu0  ;;  %v1799_v20 = vmul.f32 %v1779_v3, %v4834_v44  ;;  %v3769_v44 = vld [vmem:[#allocation17 + $0x150] ss:$8 sps:$4 sm:$0xff]   ;;  %v3772_v3 = vld [vmem:[#allocation17 + $0x160] ss:$8 sps:$4 sm:$0xff]  }
 0xf20   :  { %v1789_v19 = vmul.f32 %v1711_v29, %v4798_v17  ;;  %v1713_v30 = vpop.f32.mrb[30].mxu0 }
 0xf21   :  { %v1792_v21 = vadd.f32 %v1788_v16, %v1784_v48  ;;  %v1790_v26 = vmul.f32 %v1713_v30, %v4816_v27  ;;  %v1715_v37 = vpop.f32.mrb[31].mxu0  ;;  %v3781_v30 = vld [vmem:[#allocation17 + $0x190] ss:$8 sps:$4 sm:$0xff]  }
 0xf22   :  { %v1793_v34 = vadd.f32 %v1789_v19, %v1785_v25  ;;  %v1791_v24 = vmul.f32 %v1715_v37, %v4809_v23  ;;  %v3765_v23 = vld [vmem:[#allocation17 + $0x134] ss:$8 sps:$4 sm:$0xff]   ;;  %v3775_v25 = vld [vmem:[#allocation17 + $0x170] ss:$8 sps:$4 sm:$0xff]  }
 0xf23   :  { %v1800_v46 = vadd.f32 %v1796_v31, %v1792_v21  ;;  %v1794_v53 = vadd.f32 %v1790_v26, %v1786_v32  ;;  %v3780_v32 = vld [vmem:[#allocation17 + $0x184] ss:$8 sps:$4 sm:$0xff]   ;;  %v3783_v19 = vld [vmem:[#allocation17 + $0x194] ss:$8 sps:$4 sm:$0xff]   ;;  %v3784_v21 = vld [vmem:[#allocation17 + $0x1a0] ss:$8 sps:$4 sm:$0xff]  }
 0xf24   :  { %v1801_v56 = vadd.f32 %v1797_v33, %v1793_v34  ;;  %v1795_v17 = vadd.f32 %v1791_v24, %v1787_v6  ;;  %v3778_v6 = vld [vmem:[#allocation17 + $0x180] ss:$8 sps:$4 sm:$0xff]   ;;  %v3786_v31 = vld [vmem:[#allocation17 + $0x1a4] ss:$8 sps:$4 sm:$0xff]   ;;  %v3787_v26 = vld [vmem:[#allocation17 + $0x1b0] ss:$8 sps:$4 sm:$0xff]  }
 0xf25   :  { %v1802_v1 = vadd.f32 %v1798_v40, %v1794_v53  ;;  %v1804_v35 = vmax.f32 %v1800_v46, 0.0  ;;  %v3789_v37 = vld [vmem:[#allocation17 + $0x1b4] ss:$8 sps:$4 sm:$0xff]   ;;  %v3792_v33 = vld [vmem:[#allocation17 + $0x1c4] ss:$8 sps:$4 sm:$0xff]  }
 0xf26   :  { %v1803_v9 = vadd.f32 %v1799_v20, %v1795_v17  ;;  %v1805_v48 = vmax.f32 %v1801_v56, 0.0  ;;  %v1842_v34 = vld [vmem:[#allocation19] sm:$0x3]  ;;  %v3795_v46 = vld [vmem:[#allocation17 + $0x1d4] ss:$8 sps:$4 sm:$0xff]  }
 0xf27   :  { %v1806_v47 = vmax.f32 %v1802_v1, 0.0  ;;  %v3790_v24 = vld [vmem:[#allocation17 + $0x1c0] ss:$8 sps:$4 sm:$0xff]   ;;  %v1847_v40 = vrot.slane %v1842_v34, %v4788_v14  ;;  %v1851_v53 = vrot.slane %v1842_v34, %v4790_v15  ;;  %v3793_v20 = vld [vmem:[#allocation17 + $0x1d0] ss:$8 sps:$4 sm:$0xff]  }
 0xf28   :  { %v1807_v27 = vmax.f32 %v1803_v9, 0.0  ;;  %v3798_v9 = vld [vmem:[#allocation17 + $0x1e4] ss:$8 sps:$4 sm:$0xff]  }
 0xf29   :  { %v1840_v16 = vpack.c.bf16 %v1806_v47, %v1804_v35 }
 0xf2a   :  { %v1841_v29 = vpack.c.bf16 %v1807_v27, %v1805_v48  ;;  %v3796_v48 = vld [vmem:[#allocation17 + $0x1e0] ss:$8 sps:$4 sm:$0xff]  }
 0xf2c   :  { %2046 = vmatprep.mubr.bf16.mxu0 %v1841_v29 }
 0xf2d   :  { %2047 = vmatmul.mubr.bf16.vlgmr.msra.gmra.mrb[32].mxu0 %v1840_v16 }
 0xf2e   :  { %2525 = vmatpush1.bf16.msra.mxu0 %v4748_v50  ;;  %2556 = vmatprep.mubr.bf16.mxu0 %v4241_v36  ;;  %v3759_v50 = vld [vmem:[#allocation17 + $0x114] ss:$8 sps:$4 sm:$0xff]  }
 0xf2f   :  { %2567 = vmatprep.subr.bf16.mxu0 %v4727_v38  ;;  %v3754_v38 = vld [vmem:[#allocation17 + $0x100] ss:$8 sps:$4 sm:$0xff]  }
 0xf35   :  { %3388 = vmatmul.mubr.msk.bf16.vlgmr.msra.gmra.mrb[36].mxu0 %vm414_vm2, %v4704_v28 }
 0xf36   :  { %2568 = vmatpush1.bf16.msra.mxu0 %v4729_v41  ;;  %2599 = vmatprep.mubr.bf16.mxu0 %v4241_v36  ;;  %v3756_v41 = vld [vmem:[#allocation17 + $0x104] ss:$8 sps:$4 sm:$0xff]  }
 0xf37   :  { %2610 = vmatprep.subr.bf16.mxu0 %v4755_v51  ;;  %2481 = vmatprep.subr.bf16.mxu1 %v3756_v41  ;;  %v3757_v51 = vld [vmem:[#allocation17 + $0x110] ss:$8 sps:$4 sm:$0xff]  }
 0xf38   :  { %2482 = vmatpush1.bf16.msra.mxu1 %v3754_v38 }
 0xf39   :  { %2483 = vmatprep.subr.bf16.mxu1 %v3759_v50 }
 0xf3c   :  { %2484 = vmatpush1.bf16.msra.mxu1 %v3757_v51 }
 0xf3d   :  { %3389 = vmatmul.mubr.msk.bf16.vlgmr.msra.gmra.mrb[40].mxu0 %vm414_vm2, %v4704_v28 }
 0xf3e   :  { %2611 = vmatpush1.bf16.msra.mxu0 %v4762_v52  ;;  %2642 = vmatprep.mubr.bf16.mxu0 %v4241_v36  ;;  %v3762_v52 = vld [vmem:[#allocation17 + $0x124] ss:$8 sps:$4 sm:$0xff]  }
 0xf3f   :  { %2653 = vmatprep.subr.bf16.mxu0 %v4732_v42  ;;  %v3760_v42 = vld [vmem:[#allocation17 + $0x120] ss:$8 sps:$4 sm:$0xff]   ;;  %2485 = vmatprep.subr.bf16.mxu1 %v3762_v52 }
 0xf40   :  { %2486 = vmatpush1.bf16.msra.mxu1 %v3760_v42 }
 0xf41   :  { %2487 = vmatprep.subr.bf16.mxu1 %v3765_v23 }
 0xf44   :  { %2488 = vmatpush1.bf16.msra.mxu1 %v3763_v39  ;;  %v3799_v39 = vld [vmem:[#allocation17 + $0x1f0] ss:$8 sps:$4 sm:$0xff]  }
 0xf45   :  { %3390 = vmatmul.mubr.msk.bf16.vlgmr.msra.gmra.mrb[44].mxu0 %vm414_vm2, %v4704_v28 }
 0xf46   :  { %2654 = vmatpush1.bf16.msra.mxu0 %v4739_v45  ;;  %2685 = vmatprep.mubr.bf16.mxu0 %v4241_v36  ;;  %v3768_v45 = vld [vmem:[#allocation17 + $0x144] ss:$8 sps:$4 sm:$0xff]  }
 0xf47   :  { %2489 = vmatprep.subr.bf16.mxu1 %v3768_v45 }
 0xf48   :  { %2490 = vmatpush1.bf16.msra.mxu1 %v3766_v43 }
 0xf4d   :  { %3391 = vmatmul.mubr.msk.bf16.vlgmr.msra.gmra.mrb[48].mxu0 %vm414_vm2, %v4704_v28  ;;  %v3771_v28 = vld [vmem:[#allocation17 + $0x154] ss:$8 sps:$4 sm:$0xff]  }
 0xf4e   :  { %2491 = vmatprep.subr.bf16.mxu1 %v3771_v28 }
 0xf4f   :  { %2492 = vmatpush1.bf16.msra.mxu1 %v3769_v44 }
 0xf50   :  { %2493 = vmatprep.subr.bf16.mxu1 %v3774_v18 }
 0xf53   :  { %2494 = vmatpush1.bf16.msra.mxu1 %v3772_v3 }
 0xf54   :  { %2495 = vmatprep.subr.bf16.mxu1 %v3777_v22  ;;  %v3293_v22 = vld [vmem:[#allocation11 + $0x3] ss:$0 sm:$0xff] }
 0xf57   :  { %2496 = vmatpush1.bf16.msra.mxu1 %v3775_v25 }
 0xf58   :  { %2497 = vmatprep.subr.bf16.mxu1 %v3780_v32  ;;  %v1406_v32 = vadd.f32 %v3293_v22, %v4872_v62 }
 0xf5b   :  { %2498 = vmatpush1.bf16.msra.mxu1 %v3778_v6 }
 0xf5c   :  { %2499 = vmatprep.subr.bf16.mxu1 %v3783_v19 }
 0xf5f   :  { %2500 = vmatpush1.bf16.msra.mxu1 %v3781_v30 }
 0xf60   :  { %2501 = vmatprep.subr.bf16.mxu1 %v3786_v31  ;;  %v1412_v31 = vsel %vm414_vm2, %v1406_v32, -inf }
 0xf63   :  { %2502 = vmatpush1.bf16.msra.mxu1 %v3784_v21  ;;  %v1409_v21 = vadd.f32 %v3293_v22, %v4874_v5 }
 0xf64   :  { %2503 = vmatprep.subr.bf16.mxu1 %v3789_v37 }
 0xf67   :  { %2504 = vmatpush1.bf16.msra.mxu1 %v3787_v26  ;;  %v1415_v26 = vsel %vm414_vm2, %v1409_v21, -inf }
 0xf68   :  { %2505 = vmatprep.subr.bf16.mxu1 %v3792_v33 }
 0xf6b   :  { %2506 = vmatpush1.bf16.msra.mxu1 %v3790_v24 }
 0xf6c   :  { %2507 = vmatprep.subr.bf16.mxu1 %v3795_v46 }
 0xf6f   :  { %2508 = vmatpush1.bf16.msra.mxu1 %v3793_v20 }
 0xf70   :  { %2509 = vmatprep.subr.bf16.mxu1 %v3798_v9 }
 0xf73   :  { %2510 = vmatpush1.bf16.msra.mxu1 %v3796_v48 }
0x1000   :  { %v2048_v56 = vpop.f32.mrb[32].mxu0 }
0x1001   :  { %v2049_v17 = vadd.f32 %v2048_v56, %v1847_v40  ;;  %v2050_v1 = vpop.f32.mrb[33].mxu0 }
0x1002   :  { %v2051_v35 = vadd.f32 %v2050_v1, %v1851_v53  ;;  %v2052_v47 = vpop.f32.mrb[34].mxu0 }
0x1003   :  { %v2229_v27 = vmul.f32 %v4836_v49, %v2049_v17  ;;  %v2254_v16 = vmul.f32 %v4854_v11, %v2049_v17  ;;  %v2053_v29 = vadd.f32 %v2052_v47, %v1847_v40  ;;  %v2054_v38 = vpop.f32.mrb[35].mxu0  ;;  %2233 = vrot.lane.b32.xlu0 %v2049_v17, %s5130_s25  ;;  %v3801_v49 = vld [vmem:[#allocation17 + $0x1f4] ss:$8 sps:$4 sm:$0xff]  }
0x1004   :  { %v2230_v41 = vmul.f32 %v4838_v55, %v2051_v35  ;;  %v2253_v50 = vmul.f32 %v4852_v8, %v2051_v35  ;;  %v2055_v51 = vadd.f32 %v2054_v38, %v1851_v53  ;;  %2511 = vmatprep.subr.bf16.mxu1 %v3801_v49 }
0x1005   :  { %v2231_v52 = vmul.f32 %v4840_v57, %v2053_v29  ;;  %v2256_v42 = vmul.f32 %v4858_v54, %v2053_v29  ;;  %2235 = vrot.lane.b32.xlu1 %v2053_v29, %s5130_s25  ;;  %2512 = vmatpush1.bf16.msra.mxu1 %v3799_v39 }
0x1006   :  { %v2232_v11 = vmul.f32 %v4842_v59, %v2055_v51  ;;  %v2255_v23 = vmul.f32 %v4856_v12, %v2055_v51 }
0x1007   :  { %2237 = vrot.lane.b32.xlu0 %v2051_v35, %s5130_s25 }
0x1008   :  { %v4933_v55 = vpop.f32.mrb[36].mxu0 }
0x1009   :  { %v4935_v8 = vpop.f32.mrb[37].mxu0  ;;  %2239 = vrot.lane.b32.xlu1 %v2055_v51, %s5130_s25 }
0x100a   :  { %v4938_v57 = vpop.f32.mrb[38].mxu0 }
0x100b   :  { %v4940_v54 = vpop.f32.mrb[39].mxu0 }
0x1010   :  { %v4942_v45 = vpop.f32.mrb[40].mxu0 }
0x1011   :  { %v4944_v59 = vpop.f32.mrb[41].mxu0 }
0x1012   :  { %v4946_v12 = vpop.f32.mrb[42].mxu0 }
0x1013   :  { %v4948_v43 = vpop.f32.mrb[43].mxu0 }
0x1018   :  { %v4950_v28 = vpop.f32.mrb[44].mxu0 }
0x1019   :  { %v4952_v44 = vpop.f32.mrb[45].mxu0 }
0x101a   :  { %v4954_v18 = vpop.f32.mrb[46].mxu0 }
0x101b   :  { %v4956_v3 = vpop.f32.mrb[47].mxu0 }
0x1020   :  { %v4958_v25 = vpop.f32.mrb[48].mxu0 }
0x1021   :  { %v4961_v6 = vpop.f32.mrb[49].mxu0 }
0x1022   :  { %v4963_v19 = vpop.f32.mrb[50].mxu0 }
0x1023   :  { %v4965_v30 = vpop.f32.mrb[51].mxu0 }
0x1026   :  { %1413 = vmax.xlane.f32.xlu0 %v1412_v31 }
0x102d   :  { %1416 = vmax.xlane.f32.xlu1 %v1415_v26 }
0x1075   :  { %v2234_v37 = vpop.permute.xlu0 %2233 }
0x1077   :  { %v2236_v33 = vpop.permute.xlu1 %2235 }
0x1079   :  { %v2238_v34 = vpop.permute.xlu0 %2237 }
0x107a   :  { %v2241_v62 = vsel %vm1775_vm4, %v2234_v37, %v2238_v34  ;;  %v2243_v24 = vsel %vm1775_vm4, %v2238_v34, %v2234_v37 }
0x107b   :  { %v2245_v40 = vmul.f32 %v2243_v24, %v4844_v61  ;;  %v2246_v46 = vmul.f32 %v2241_v62, %v4846_v63  ;;  %v2240_v53 = vpop.permute.xlu1 %2239  ;;  %v2261_v35 = vmul.f32 %v2241_v62, %v4860_v13  ;;  %v2262_v47 = vmul.f32 %v2243_v24, %v4862_v58  ;;  %v3807_v62 = vld [vmem:[#allocation17 + $0x204] ss:$8 sps:$4 sm:$0xff]   ;;  %v3810_v24 = vld [vmem:[#allocation17 + $0x214] ss:$8 sps:$4 sm:$0xff]  }
0x107c   :  { %v2242_v5 = vsel %vm1775_vm4, %v2236_v33, %v2240_v53  ;;  %v2244_v20 = vsel %vm1775_vm4, %v2240_v53, %v2236_v33  ;;  %2948 = vmatprep.subr.bf16.mxu0 %v3807_v62  ;;  %v3811_v53 = vld [vmem:[#allocation17 + $0x220] ss:$8 sps:$4 sm:$0xff]  }
0x107d   :  { %v2249_v56 = vadd.f32 %v2245_v40, %v2229_v27  ;;  %v2250_v17 = vadd.f32 %v2246_v46, %v2230_v41  ;;  %v2247_v1 = vmul.f32 %v2244_v20, %v4848_v2  ;;  %v2248_v9 = vmul.f32 %v2242_v5, %v4850_v4  ;;  %v3808_v40 = vld [vmem:[#allocation17 + $0x210] ss:$8 sps:$4 sm:$0xff]   ;;  %v3813_v46 = vld [vmem:[#allocation17 + $0x224] ss:$8 sps:$4 sm:$0xff]  }
0x107e   :  { %v2263_v38 = vmul.f32 %v2242_v5, %v4864_v7  ;;  %v2264_v51 = vmul.f32 %v2244_v20, %v4866_v10  ;;  %v3816_v5 = vld [vmem:[#allocation17 + $0x234] ss:$8 sps:$4 sm:$0xff]   ;;  %v3814_v20 = vld [vmem:[#allocation17 + $0x230] ss:$8 sps:$4 sm:$0xff]  }
0x107f   :  { %v2257_v61 = vadd.f32 %v2253_v50, %v2249_v56  ;;  %v2258_v48 = vadd.f32 %v2254_v16, %v2250_v17  ;;  %v2251_v63 = vadd.f32 %v2247_v1, %v2231_v52  ;;  %v2252_v29 = vadd.f32 %v2248_v9, %v2232_v11  ;;  %v3819_v56 = vld [vmem:[#allocation17 + $0x244] ss:$8 sps:$4 sm:$0xff]   ;;  %v3817_v17 = vld [vmem:[#allocation17 + $0x240] ss:$8 sps:$4 sm:$0xff]   ;;  %v3822_v1 = vld [vmem:[#allocation17 + $0x254] ss:$8 sps:$4 sm:$0xff]  }
0x1080   :  { %v3820_v9 = vld [vmem:[#allocation17 + $0x250] ss:$8 sps:$4 sm:$0xff]  }
0x1081   :  { %v2265_v49 = vadd.f32 %v2261_v35, %v2257_v61  ;;  %v2266_v39 = vadd.f32 %v2262_v47, %v2258_v48  ;;  %v2259_v27 = vadd.f32 %v2255_v23, %v2251_v63  ;;  %v2260_v41 = vadd.f32 %v2256_v42, %v2252_v29  ;;  %v3825_v35 = vld [vmem:[#allocation17 + $0x264] ss:$8 sps:$4 sm:$0xff]   ;;  %v3823_v47 = vld [vmem:[#allocation17 + $0x260] ss:$8 sps:$4 sm:$0xff]   ;;  %v3828_v61 = vld [vmem:[#allocation17 + $0x274] ss:$8 sps:$4 sm:$0xff]  }
0x1082   :  { %v3826_v48 = vld [vmem:[#allocation17 + $0x270] ss:$8 sps:$4 sm:$0xff]   ;;  %v3831_v63 = vld [vmem:[#allocation17 + $0x284] ss:$8 sps:$4 sm:$0xff]   ;;  %v3829_v29 = vld [vmem:[#allocation17 + $0x280] ss:$8 sps:$4 sm:$0xff]  }
0x1083   :  { %v2267_v22 = vadd.f32 %v2263_v38, %v2259_v27  ;;  %v2268_v2 = vadd.f32 %v2264_v51, %v2260_v41  ;;  %v2269_v31 = vmax.f32 %v2265_v49, 0.0  ;;  %v2270_v4 = vmax.f32 %v2266_v39, 0.0  ;;  %v3834_v38 = vld [vmem:[#allocation17 + $0x294] ss:$8 sps:$4 sm:$0xff]   ;;  %v3832_v51 = vld [vmem:[#allocation17 + $0x290] ss:$8 sps:$4 sm:$0xff]  }
0x1084   :  { %v3837_v49 = vld [vmem:[#allocation17 + $0x2a4] ss:$8 sps:$4 sm:$0xff]   ;;  %v3835_v39 = vld [vmem:[#allocation17 + $0x2a0] ss:$8 sps:$4 sm:$0xff]   ;;  %v3840_v41 = vld [vmem:[#allocation17 + $0x2b4] ss:$8 sps:$4 sm:$0xff]  }
0x1085   :  { %v2271_v26 = vmax.f32 %v2267_v22, 0.0  ;;  %v2272_v13 = vmax.f32 %v2268_v2, 0.0  ;;  %v3838_v22 = vld [vmem:[#allocation17 + $0x2b0] ss:$8 sps:$4 sm:$0xff]   ;;  %v2309_v2 = vld [vmem:[#allocation19 + $0x2] sm:$0x3] }
0x1087   :  { %v2306_v37 = vpack.c.bf16 %v2271_v26, %v2269_v31  ;;  %v2307_v58 = vpack.c.bf16 %v2272_v13, %v2270_v4  ;;  %v3843_v4 = vld [vmem:[#allocation17 + $0x2c4] ss:$8 sps:$4 sm:$0xff]   ;;  %v2314_v26 = vrot.slane %v2309_v2, %v4788_v14  ;;  %v3841_v13 = vld [vmem:[#allocation17 + $0x2c0] ss:$8 sps:$4 sm:$0xff]  }
0x1089   :  { %2513 = vmatprep.mubr.bf16.mxu1 %v2307_v58 }
0x108a   :  { %2514 = vmatmul.mubr.bf16.vlgmr.msra.gmra.mrb[64].mxu1 %v2306_v37  ;;  %v2318_v37 = vrot.slane %v2309_v2, %v4790_v15 }
0x108b   :  { %3039 = vmatprep.mubr.bf16.mxu1 %v4241_v36  ;;  %v3804_v36 = vld [vmem:[%s5131_s28 + $0x4] ss:$8 sps:$4 sm:$0xff]  }
0x108c   :  { %3007 = vmatprep.subr.bf16.mxu1 %v3804_v36 }
0x10b3   :  { %v1414_v16 = vpop.xlane.xlu0 %1413 }
0x10b4   :  { %v1418_v7 = vsub.f32 %v1406_v32, %v1414_v16  ;;  %v3802_v32 = vld [vmem:[%s5131_s28] ss:$8 sps:$4 sm:$0xff]  }
0x10b5   :  { %3008 = vmatpush1.bf16.msra.mxu1 %v3802_v32  ;;  %v3846_v16 = vld [vmem:[#allocation17 + $0x2d4] ss:$8 sps:$4 sm:$0xff]  }
0x10b6   :  { %v1420_v50 = vmul.f32 1.442695, %v1418_v7  ;;  %3607 = vmatprep.subr.bf16.mxu1 %v4239_v0 }
0x10b8   :  { %3885 = vpow2.f32 %v1420_v50 }
0x10ba   :  { %v1417_v10 = vpop.xlane.xlu1 %1416 }
0x10bb   :  { %v1419_v52 = vsub.f32 %v1409_v21, %v1417_v10  ;;  %v3805_v21 = vld [vmem:[#allocation17 + $0x200] ss:$8 sps:$4 sm:$0xff]   ;;  %v3844_v10 = vld [vmem:[#allocation17 + $0x2d0] ss:$8 sps:$4 sm:$0xff]  }
0x10bc   :  { %2949 = vmatpush1.bf16.msra.mxu0 %v3805_v21 }
0x10bd   :  { %v1422_v11 = vmul.f32 1.442695, %v1419_v52  ;;  %2950 = vmatprep.subr.bf16.mxu0 %v3810_v24 }
0x10bf   :  { %3887 = vpow2.f32 %v1422_v11 }
0x10c0   :  { %2951 = vmatpush1.bf16.msra.mxu0 %v3808_v40 }
0x10c1   :  { %2952 = vmatprep.subr.bf16.mxu0 %v3813_v46  ;;  %v3849_v46 = vld [vmem:[#allocation17 + $0x2e4] ss:$8 sps:$4 sm:$0xff]  }
0x10c2   :  { %v4987_v42 = vpop.eup %3885 }
0x10c3   :  { %v1424_v23 = vsel %vm414_vm2, %v4987_v42, 0.0 }
0x10c4   :  { %1425 = vadd.xlane.f32.xlu0 %v1424_v23  ;;  %2953 = vmatpush1.bf16.msra.mxu0 %v3811_v53 }
0x10c5   :  { %2954 = vmatprep.subr.bf16.mxu0 %v3816_v5  ;;  %v3847_v5 = vld [vmem:[#allocation17 + $0x2e0] ss:$8 sps:$4 sm:$0xff]  }
0x10c8   :  { %2955 = vmatpush1.bf16.msra.mxu0 %v3814_v20 }
0x10c9   :  { %v4991_v33 = vpop.eup %3887  ;;  %2956 = vmatprep.subr.bf16.mxu0 %v3819_v56 }
0x10ca   :  { %v1427_v34 = vsel %vm414_vm2, %v4991_v33, 0.0 }
0x10cb   :  { %1428 = vadd.xlane.f32.xlu0 %v1427_v34 }
0x10cc   :  { %2957 = vmatpush1.bf16.msra.mxu0 %v3817_v17 }
0x10cd   :  { %2958 = vmatprep.subr.bf16.mxu0 %v3822_v1 }
0x10d0   :  { %2959 = vmatpush1.bf16.msra.mxu0 %v3820_v9  ;;  %v3850_v9 = vld [vmem:[#allocation17 + $0x2f0] ss:$8 sps:$4 sm:$0xff]  }
0x10d1   :  { %2960 = vmatprep.subr.bf16.mxu0 %v3825_v35 }
0x10d4   :  { %2961 = vmatpush1.bf16.msra.mxu0 %v3823_v47 }
0x10d5   :  { %2962 = vmatprep.subr.bf16.mxu0 %v3828_v61 }
0x10d8   :  { %2963 = vmatpush1.bf16.msra.mxu0 %v3826_v48 }
0x10d9   :  { %2964 = vmatprep.subr.bf16.mxu0 %v3831_v63 }
0x10dc   :  { %2965 = vmatpush1.bf16.msra.mxu0 %v3829_v29 }
0x10dd   :  { %2966 = vmatprep.subr.bf16.mxu0 %v3834_v38 }
0x10e0   :  { %2967 = vmatpush1.bf16.msra.mxu0 %v3832_v51 }
0x10e1   :  { %2968 = vmatprep.subr.bf16.mxu0 %v3837_v49 }
0x10e4   :  { %2969 = vmatpush1.bf16.msra.mxu0 %v3835_v39 }
0x10e5   :  { %2970 = vmatprep.subr.bf16.mxu0 %v3840_v41 }
0x10e8   :  { %2971 = vmatpush1.bf16.msra.mxu0 %v3838_v22 }
0x10e9   :  { %2972 = vmatprep.subr.bf16.mxu0 %v3843_v4 }
0x10ec   :  { %2973 = vmatpush1.bf16.msra.mxu0 %v3841_v13 }
0x10ed   :  { %2974 = vmatprep.subr.bf16.mxu0 %v3846_v16 }
0x10f0   :  { %2975 = vmatpush1.bf16.msra.mxu0 %v3844_v10 }
0x10f1   :  { %2976 = vmatprep.subr.bf16.mxu0 %v3849_v46 }
0x10f4   :  { %2977 = vmatpush1.bf16.msra.mxu0 %v3847_v5 }
0x1151   :  { %v1426_v27 = vpop.xlane.xlu0 %1425 }
0x1152   :  { %3889 = vrcp.f32 %v1426_v27 }
0x1158   :  { %v1429_v31 = vpop.xlane.xlu0 %1428 }
0x1159   :  { %3891 = vrcp.f32 %v1429_v31 }
0x115c   :  { %v3890_v21 = vpop.eup %3889 }
0x115d   :  { %v2515_v58 = vpop.f32.mrb[64].mxu1  ;;  %v1432_v17 = vmul.f32 %v3890_v21, %v4987_v42  ;;  %v3859_v21 = vld [vmem:[%s5132_s3 + $0x30] sm:$0xff]  }
0x115e   :  { %v2516_v7 = vadd.f32 %v2515_v58, %v2314_v26  ;;  %v2517_v50 = vpop.f32.mrb[65].mxu1 }
0x115f   :  { %v2518_v52 = vadd.f32 %v2517_v50, %v2318_v37  ;;  %v2519_v11 = vpop.f32.mrb[66].mxu1 }
0x1160   :  { %v2696_v23 = vmul.f32 %v4933_v55, %v2516_v7  ;;  %v2721_v34 = vmul.f32 %v4952_v44, %v2516_v7  ;;  %v2520_v36 = vadd.f32 %v2519_v11, %v2314_v26  ;;  %v2521_v32 = vpop.f32.mrb[67].mxu1  ;;  %2700 = vrot.lane.b32.xlu0 %v2516_v7, %s5130_s25  ;;  %v3855_v11 = vld [vmem:[%s5132_s3 + $0x10] sm:$0xff]  }
0x1161   :  { %v2697_v62 = vmul.f32 %v4935_v8, %v2518_v52  ;;  %v2720_v24 = vmul.f32 %v4950_v28, %v2518_v52  ;;  %v2522_v40 = vadd.f32 %v2521_v32, %v2318_v37  ;;  %2704 = vrot.lane.b32.xlu1 %v2518_v52, %s5130_s25  ;;  %v3852_v28 = vld [vmem:[#allocation17 + $0x2f4] ss:$8 sps:$4 sm:$0xff]   ;;  %v2776_v32 = vld [vmem:[#allocation19 + $0x4] sm:$0x3] }
0x1162   :  { %v2698_v53 = vmul.f32 %v4938_v57, %v2520_v36  ;;  %v2723_v55 = vmul.f32 %v4956_v3, %v2520_v36  ;;  %2978 = vmatprep.subr.bf16.mxu0 %v3852_v28 }
0x1163   :  { %v3892_v44 = vpop.eup %3891  ;;  %v2699_v20 = vmul.f32 %v4940_v54, %v2522_v40  ;;  %v2722_v56 = vmul.f32 %v4954_v18, %v2522_v40  ;;  %2979 = vmatpush1.bf16.msra.mxu0 %v3850_v9 }
0x1164   :  { %v1433_v8 = vmul.f32 %v3892_v44, %v4991_v33 }
0x1165   :  { %2702 = vrot.lane.b32.xlu1 %v2520_v36, %s5130_s25  ;;  %v3858_v36 = vld [vmem:[%s5132_s3 + $0x28] sm:$0xff]  }
0x1166   :  { %v2993_v1 = vpack.c.bf16 %v1433_v8, %v1432_v17 }
0x1168   :  { %3426 = vmatmul.mubr.msk.bf16.vlgmr.msra.gmra.mrb[68].mxu1 %vm414_vm2, %v2993_v1 }
0x1169   :  { %2706 = vrot.lane.b32.xlu1 %v2522_v40, %s5130_s25  ;;  %3623 = vmatprep.mubr.msk.bf16.mxu1 %vm4240_vm0, %v4239_v0  ;;  %v3860_v40 = vld [vmem:[%s5132_s3 + $0x38] sm:$0xff]  }
0x11d2   :  { %v2701_v57 = vpop.permute.xlu0 %2700 }
0x11d3   :  { %v2705_v54 = vpop.permute.xlu1 %2704 }
0x11d4   :  { %v2708_v18 = vsel %vm1775_vm4, %v2701_v57, %v2705_v54  ;;  %v2710_v3 = vsel %vm1775_vm4, %v2705_v54, %v2701_v57 }
0x11d5   :  { %v2712_v42 = vmul.f32 %v2710_v3, %v4942_v45  ;;  %v2713_v33 = vmul.f32 %v2708_v18, %v4944_v59  ;;  %v2728_v29 = vmul.f32 %v2708_v18, %v4958_v25  ;;  %v2729_v38 = vmul.f32 %v2710_v3, %v4961_v6 }
0x11d7   :  { %v2716_v35 = vadd.f32 %v2712_v42, %v2696_v23  ;;  %v2717_v47 = vadd.f32 %v2713_v33, %v2697_v62  ;;  %v2703_v61 = vpop.permute.xlu1 %2702  ;;  %v3856_v23 = vld [vmem:[%s5132_s3 + $0x18] sm:$0xff]   ;;  %v2781_v62 = vrot.slane %v2776_v32, %v4788_v14 }
0x11d9   :  { %v2724_v48 = vadd.f32 %v2720_v24, %v2716_v35  ;;  %v2725_v63 = vadd.f32 %v2721_v34, %v2717_v47  ;;  %v3857_v34 = vld [vmem:[%s5132_s3 + $0x20] sm:$0xff]   ;;  %v2785_v24 = vrot.slane %v2776_v32, %v4790_v15  ;;  %v3427_v35 = vld [vmem:[#allocation20] ss:$0 sm:$0xff] }
0x11db   :  { %v2732_v51 = vadd.f32 %v2728_v29, %v2724_v48  ;;  %v2733_v49 = vadd.f32 %v2729_v38, %v2725_v63  ;;  %v2707_v39 = vpop.permute.xlu1 %2706 }
0x11dc   :  { %v2709_v27 = vsel %vm1775_vm4, %v2703_v61, %v2707_v39  ;;  %v2711_v45 = vsel %vm1775_vm4, %v2707_v39, %v2703_v61 }
0x11dd   :  { %v2714_v59 = vmul.f32 %v2711_v45, %v4946_v12  ;;  %v2715_v41 = vmul.f32 %v2709_v27, %v4948_v43  ;;  %v2730_v25 = vmul.f32 %v2709_v27, %v4963_v19  ;;  %v2731_v6 = vmul.f32 %v2711_v45, %v4965_v30  ;;  %v3853_v19 = vld [vmem:[%s5132_s3] sm:$0xff]   ;;  %v3854_v30 = vld [vmem:[%s5132_s3 + $0x8] sm:$0xff]  }
0x11de   :  { %v2736_v37 = vmax.f32 %v2732_v51, 0.0  ;;  %v2737_v58 = vmax.f32 %v2733_v49, 0.0  ;;  %3608 = vmatpush3.bf16.msra.mxu1 %v3853_v19 }
0x11df   :  { %v2718_v22 = vadd.f32 %v2714_v59, %v2698_v53  ;;  %v2719_v2 = vadd.f32 %v2715_v41, %v2699_v20  ;;  %3609 = vmatprep.subr.bf16.mxu1 %v4239_v0 }
0x11e1   :  { %v2726_v31 = vadd.f32 %v2722_v56, %v2718_v22  ;;  %v2727_v4 = vadd.f32 %v2723_v55, %v2719_v2 }
0x11e2   :  { %3610 = vmatpush3.bf16.msra.mxu1 %v3854_v30 }
0x11e3   :  { %v2734_v26 = vadd.f32 %v2730_v25, %v2726_v31  ;;  %v2735_v13 = vadd.f32 %v2731_v6, %v2727_v4  ;;  %3611 = vmatprep.subr.bf16.mxu1 %v4239_v0 }
0x11e5   :  { %v2738_v16 = vmax.f32 %v2734_v26, 0.0  ;;  %v2739_v7 = vmax.f32 %v2735_v13, 0.0 }
0x11e6   :  { %3612 = vmatpush3.bf16.msra.mxu1 %v3855_v11 }
0x11e7   :  { %v2773_v60 = vpack.c.bf16 %v2738_v16, %v2736_v37  ;;  %v2774_v50 = vpack.c.bf16 %v2739_v7, %v2737_v58  ;;  %3613 = vmatprep.subr.bf16.mxu1 %v4239_v0 }
0x11e9   :  { %2980 = vmatprep.mubr.bf16.mxu0 %v2774_v50 }
0x11ea   :  { %2981 = vmatmul.mubr.bf16.vlgmr.msra.gmra.mrb[52].mxu0 %v2773_v60  ;;  %3614 = vmatpush3.bf16.msra.mxu1 %v3856_v23 }
0x11eb   :  { %3615 = vmatprep.subr.bf16.mxu1 %v4239_v0 }
0x11ee   :  { %3616 = vmatpush3.bf16.msra.mxu1 %v3857_v34 }
0x11ef   :  { %3617 = vmatprep.subr.bf16.mxu1 %v4239_v0 }
0x11f2   :  { %3618 = vmatpush3.bf16.msra.mxu1 %v3858_v36 }
0x11f3   :  { %3619 = vmatprep.subr.bf16.mxu1 %v4239_v0 }
0x11f6   :  { %3620 = vmatpush3.bf16.msra.mxu1 %v3859_v21 }
0x11f7   :  { %3621 = vmatprep.subr.bf16.mxu1 %v4239_v0 }
0x11fa   :  { %3622 = vmatpush3.bf16.msra.mxu1 %v3860_v40 }
0x123b   :  { %v3041_v12 = vpop.f32.mrb[68].mxu1 }
0x123c   :  { %v3043_v43 = vpop.f32.mrb[69].mxu1 }
0x123d   :  { %v3045_v10 = vpop.f32.mrb[70].mxu1 }
0x123e   :  { %v3047_v52 = vpop.f32.mrb[71].mxu1 }
0x12bd   :  { %v2982_v46 = vpop.f32.mrb[52].mxu0 }
0x12be   :  { %v2983_v53 = vadd.f32 %v2982_v46, %v2781_v62  ;;  %v2984_v55 = vpop.f32.mrb[53].mxu0 }
0x12bf   :  { %v2985_v5 = vadd.f32 %v2984_v55, %v2785_v24  ;;  %v2986_v44 = vpop.f32.mrb[54].mxu0 }
0x12c0   :  { %v3050_v20 = vmul.f32 %v3041_v12, %v2983_v53  ;;  %v2987_v56 = vadd.f32 %v2986_v44, %v2781_v62  ;;  %v2988_v17 = vpop.f32.mrb[55].mxu0 }
0x12c1   :  { %v3051_v8 = vmul.f32 %v3043_v43, %v2985_v5  ;;  %v2989_v14 = vadd.f32 %v2988_v17, %v2785_v24 }
0x12c2   :  { %v3052_v28 = vmul.f32 %v3045_v10, %v2987_v56 }
0x12c3   :  { %v3053_v1 = vmul.f32 %v3047_v52, %v2989_v14  ;;  %v3054_v15 = vadd.f32 %v3051_v8, %v3050_v20 }
0x12c5   :  { %3056 = vrot.lane.b32.xlu0 %v3054_v15, %s5130_s25  ;;  %v3055_v0 = vadd.f32 %v3053_v1, %v3052_v28 }
0x12c7   :  { %3058 = vrot.lane.b32.xlu1 %v3055_v0, %s5130_s25  ;;  %s4179_s25 = scalar_lea.vmem %s3185_s17, 256 }
0x12c8   :  { %p4180_p6 = scmp.ne.s32.totalorder %s3185_s17, %s4179_s25  ;;  %p4185_p8 = scmp.lt.s32.totalorder %s4179_s25, %s4179_s25 }
0x12ca   :  { %p4186_p9 = por %p4185_p8, %p4184_p7 }
0x12cc   :  { %p4187_p10 = pnand %p4186_p9, %p4180_p6 }
0x1337   :  { %v3057_v9 = vpop.permute.xlu0 %3056 }
0x1338   :  { %v3060_v57 = vadd.f32 %v3057_v9, %v3054_v15 }
0x1339   :  { %v3059_v54 = vpop.permute.xlu1 %3058 }
0x133a   :  { %v3061_v18 = vadd.f32 %v3059_v54, %v3055_v0  ;;  %v3062_v3 = vmax.f32 %v3060_v57, 0.0 }
0x133c   :  { %v3063_v42 = vmax.f32 %v3061_v18, 0.0 }
0x133e   :  { %v3080_v33 = vpack.c.bf16 %v3063_v42, %v3062_v3 }
0x1340   :  { %3624 = vmatmul.mubr.bf16.vlgmr.msra.gmra.mrb[72].mxu1 %v3080_v33 }
0x1413   :  { %v3170_v47 = vpop.f32.mrb[72].mxu1 }
0x1414   :  { %v3171_v61 = vadd.f32 %v3427_v35, %v3170_v47  ;;  %v3625_v48 = vpop.f32.mrb[73].mxu1 }
0x1415   :  { %v3173_v63 = vpop.f32.mrb[74].mxu1 }
0x1416   :  { %3177 = vst [vmem:[#allocation23] sm:$0xff] %v3171_v61  ;;  %v3174_v29 = vadd.f32 %v3427_v35, %v3173_v63  ;;  %v3626_v38 = vpop.f32.mrb[75].mxu1 }
0x1418   :  { %3178 = vst [vmem:[#allocation23 + $0x8] sm:$0xff] %v3174_v29 }
0x1419   :  { %4190 = shalt.err (!%p4187_p10)
}
0x141a   :  { %s5133_s0 = sld [smem:[#allocation38_spill]] }
0x1420   :  { %s4191_s21 = scalar_lea.hbm %s5133_s0, 256 }
0x1421   :  { %p4192_p11 = scmp.ne.s32.totalorder %s5133_s0, %s4191_s21  ;;  %p4195_p12 = scmp.lt.u32.totalorder %s4191_s21, %s5133_s0 }
0x1423   :  { %p4197_p13 = pnand %p4195_p12, %p4192_p11 }
0x1425   :  { %4200 = shalt.err (!%p4197_p13)
}
0x1426   :  { %3190 = dma.vmem_to_hbm [thread:$0]  %s3185_s17, 256, %s5133_s0, [#allocation4], %s4218_s26, %s4218_s26, %s4219_s27  }
0x1427   :  { %4215 = dma.done.wait [#allocation4], 256  }
0x1428   :  { %4216 = vsyncadd [#allocation4], 4294967040 }
0x1429   :  { %3194 = vsyncpa [#allocation3], 1 }
0x142a   :  { %3195 = vsyncpa [#allocation6], 1 }
0x142b   :  { %3196 = vsyncpa [#allocation9], 1 }
0x142c   :  { %3197 = vsyncpa [#allocation12], 1 }
0x142d   :  { %3198 = vsyncpa [#allocation15], 1 }
0x142e   :  { %3199 = vsyncpa [#allocation18], 1 }
0x142f   :  { %3200 = vsyncpa [#allocation21], 1 }
0x1430   :  { %3201 = vsyncpa [#allocation4], 1 }

</bundles_post_ra>
